<compile_context>
chip_gen: v5e
topology: v5e:2x2
jax: 0.10.0
libtpu: 0.0.40
codegen_flags: <defaults>
</compile_context>

<pallas_src>
import functools

import numpy as np
import jax
import jax.numpy as jnp
from jax.experimental import pallas as pl
from jax.experimental.pallas import tpu as pltpu


_NEG_FILL = -1e30          # finite mask_bef fill (avoids -inf -> NaN hazard)
_MM_DTYPE = jnp.bfloat16   # MXU operand dtype on v5e / v6e / v7x
_BATCH_SPLIT = None        # None -> auto (2 if batch even else 1). v7x wants 2
                           # (one batch shard per TensorCore); set 1 on v5e/v6e
                           # to fold the whole batch into one matmul M.


# ----------------------------------------------------------------------------
# In-kernel math helpers
# ----------------------------------------------------------------------------

def _mm(a, b):
    """bf16-operand MXU matmul with f32 accumulation (weights already bf16)."""
    return jnp.dot(a.astype(_MM_DTYPE), b.astype(_MM_DTYPE),
                   preferred_element_type=jnp.float32)


def _layernorm(x, g, b, eps=1e-5):
    mean = jnp.mean(x, axis=-1, keepdims=True)
    var = jnp.mean(jnp.square(x - mean), axis=-1, keepdims=True)
    return (x - mean) * jax.lax.rsqrt(var + eps) * g + b


# ----------------------------------------------------------------------------
# Fused FFT-block-STACK kernel
#   grid = (batch_split, n_blocks); per-block weights indexed by the block axis;
#   X carried in the VMEM-resident output block across the block axis.
# ----------------------------------------------------------------------------

def _fft_stack_kernel(qlen_ref, klen_ref, x_ref, *rest,
                      Bp, Lq, Lk, Dq, Dk, H, Dh, Dv, Ch, ksize, scale,
                      self_attn, norm_first, need_attn, need_block_out):
    i = 0
    xk_ref = None
    if not self_attn:
        xk_ref = rest[i]; i += 1
    (ln1g_ref, ln1b_ref, wq_ref, bq_ref, wk_ref, bk_ref, wv_ref, bv_ref,
     wo_ref, bo_ref, ln2g_ref, ln2b_ref,
     w1_ref, b1_ref, w2_ref, b2_ref) = rest[i:i + 16]
    i += 16
    out_ref = rest[i]; i += 1
    attn_ref = None
    if need_attn:
        attn_ref = rest[i]; i += 1
    blkout_ref = rest[i] if need_block_out else None

    p_idx = pl.program_id(0)     # batch shard (parallel)
    blk = pl.program_id(1)       # FFT block index within the stack (arbitrary)
    pad = (ksize - 1) // 2

    # X is carried in the VMEM-resident output block; load from HBM once.
    @pl.when(blk == 0)
    def _():
        out_ref[...] = x_ref[...]

    x = out_ref[...]                                      # [Bp, Lq, Dq] f32

    # Masks rebuilt in-kernel from scalar-prefetched lengths (1.0 == padded).
    base = p_idx * Bp
    kcol = jax.lax.broadcasted_iota(jnp.int32, (1, 1, Lk), 2)
    qrow = jax.lax.broadcasted_iota(jnp.int32, (1, Lq, 1), 1)
    km_rows = [(kcol >= klen_ref[base + b]).astype(jnp.float32) for b in range(Bp)]
    qm_rows = [(qrow >= qlen_ref[base + b]).astype(jnp.float32) for b in range(Bp)]
    km = km_rows[0] if Bp == 1 else jnp.concatenate(km_rows, axis=0)   # [Bp,1,Lk]
    qm = qm_rows[0] if Bp == 1 else jnp.concatenate(qm_rows, axis=0)   # [Bp,Lq,1]

    def attention(xq3, xk3):
        # Projections with batch folded into M (one MXU matmul each).
        q = _mm(xq3.reshape(Bp * Lq, Dq), wq_ref[0]) + bq_ref[0]       # [Bp*Lq,H*Dh]
        k = _mm(xk3.reshape(Bp * Lk, Dk), wk_ref[0]) + bk_ref[0]
        v = _mm(xk3.reshape(Bp * Lk, Dk), wv_ref[0]) + bv_ref[0]
        q3 = q.reshape(Bp, Lq, H * Dh)
        k3 = k.reshape(Bp, Lk, H * Dh)
        v3 = v.reshape(Bp, Lk, H * Dv)
        head_outs, probs = [], []
        for h in range(H):
            qh = q3[:, :, h * Dh:(h + 1) * Dh]
            kh = k3[:, :, h * Dh:(h + 1) * Dh]
            vh = v3[:, :, h * Dv:(h + 1) * Dv]
            # scores batched over the folded batch dim: [Bp, Lq, Lk]
            s = jax.lax.dot_general(qh.astype(_MM_DTYPE), kh.astype(_MM_DTYPE),
                                    (((2,), (2,)), ((0,), (0,))),
                                    preferred_element_type=jnp.float32) * scale
            s = jnp.where(km > 0.5, _NEG_FILL, s)                     # mask_bef
            m = jnp.max(s, axis=-1, keepdims=True)
            e = jnp.exp(s - m)
            p = e / jnp.sum(e, axis=-1, keepdims=True)                # exact divide
            p = jnp.where(qm > 0.5, 0.0, p)                           # mask_aft
            probs.append(p)
            head_outs.append(jax.lax.dot_general(
                p.astype(_MM_DTYPE), vh.astype(_MM_DTYPE),
                (((2,), (1,)), ((0,), (0,))),
                preferred_element_type=jnp.float32))                  # [Bp,Lq,Dv]
        o = head_outs[0] if H == 1 else jnp.concatenate(head_outs, axis=-1)
        # concat(o_h) @ wo as ONE matmul
        out = _mm(o.reshape(Bp * Lq, H * Dv), wo_ref[0]) + bo_ref[0]
        return out.reshape(Bp, Lq, Dq), probs

    def taps(x3, C):
        # Shifted conv taps via static slices + zero edge pads (no scratch fill).
        if ksize == 1:
            return x3
        cols = []
        for j in range(ksize):
            r = j - pad
            if r == 0:
                cols.append(x3)
            elif r > 0:
                z = jnp.zeros((Bp, r, C), x3.dtype)
                cols.append(jnp.concatenate([x3[:, r:, :], z], axis=1))
            else:
                z = jnp.zeros((Bp, -r, C), x3.dtype)
                cols.append(jnp.concatenate([z, x3[:, :r, :]], axis=1))
        return jnp.concatenate(cols, axis=-1)                         # [Bp,Lq,k*C]

    def conv_ffn(x3):
        t1 = taps(x3, Dq).reshape(Bp * Lq, ksize * Dq)
        h = jnp.maximum(_mm(t1, w1_ref[0]) + b1_ref[0], 0.0)
        t2 = taps(h.reshape(Bp, Lq, Ch), Ch).reshape(Bp * Lq, ksize * Ch)
        y = _mm(t2, w2_ref[0]) + b2_ref[0]
        return y.reshape(Bp, Lq, Dq)

    ln1g, ln1b = ln1g_ref[0], ln1b_ref[0]
    ln2g, ln2b = ln2g_ref[0], ln2b_ref[0]

    if norm_first:
        xq_n = _layernorm(x, ln1g, ln1b)
        xk_att = xq_n if self_attn else xk_ref[...].astype(jnp.float32)
        a, probs = attention(xq_n, xk_att)
        x = x + a
        x = x + conv_ffn(_layernorm(x, ln2g, ln2b))
    else:
        xk_att = x if self_attn else xk_ref[...].astype(jnp.float32)
        a, probs = attention(x, xk_att)
        x = _layernorm(x + a, ln1g, ln1b)
        x = _layernorm(x + conv_ffn(x), ln2g, ln2b)

    out_ref[...] = x
    if need_attn:
        for b in range(Bp):
            for h in range(H):
                attn_ref[b, h] = probs[h][b]
    if need_block_out:
        blkout_ref[...] = x


# ----------------------------------------------------------------------------
# pallas_call wrapper for a stack of FFT blocks
# ----------------------------------------------------------------------------

def pallas_fft_stack(stack, Xq, q_lens, k_lens, Xk=None,
                     need_attn=False, need_block_out=False, batch_split=None):
    """Run a full stack of FFT blocks (self-attn if Xk is None) in one pallas_call.

    Xq: [B, Lq, Dq]; Xk: [B, Lk, Dk] or None; q_lens/k_lens: [B] int lengths.
    Returns (X_out [B,Lq,Dq], attn [n_blocks,B,H,Lq,Lk] | None,
             block_outs [n_blocks,B,Lq,Dq] | None).
    """
    meta = stack["meta"]
    B, Lq, Dq = Xq.shape
    self_attn = Xk is None
    Lk = Lq if self_attn else Xk.shape[1]
    Dk = Dq if self_attn else Xk.shape[2]
    H, Dh, Dv = meta["n_heads"], meta["hid_dim"], meta["out_dim_v"]
    ksize, Ch = meta["ksize"], meta["conv_hid"]
    n_blocks = stack["wq"].shape[0]

    if batch_split is None:
        batch_split = _BATCH_SPLIT
    if batch_split is None:
        batch_split = 2 if (B % 2 == 0 and B >= 2) else 1
    Bp = B // batch_split

    wnames = ["ln1_g", "ln1_b", "wq", "bq", "wk", "bk", "wv", "bv",
              "wo", "bo", "ln2_g", "ln2_b", "w1", "b1", "w2", "b2"]
    weights = [stack[n] for n in wnames]

    in_specs = [pl.BlockSpec((Bp, Lq, Dq), lambda p, blk, ql, kl: (p, 0, 0))]
    inputs = [Xq.astype(jnp.float32)]
    if not self_attn:                       # Xk only DMA'd when actually used
        in_specs.append(pl.BlockSpec((Bp, Lk, Dk), lambda p, blk, ql, kl: (p, 0, 0)))
        inputs.append(Xk.astype(jnp.float32))
    in_specs += [pl.BlockSpec((1,) + w.shape[1:], lambda p, blk, ql, kl: (blk, 0, 0))
                 for w in weights]
    inputs += weights

    out_shape = [jax.ShapeDtypeStruct((B, Lq, Dq), jnp.float32)]
    out_specs = [pl.BlockSpec((Bp, Lq, Dq), lambda p, blk, ql, kl: (p, 0, 0))]
    if need_attn:
        out_shape.append(jax.ShapeDtypeStruct((n_blocks * B, H, Lq, Lk), jnp.float32))
        out_specs.append(pl.BlockSpec(
            (Bp, H, Lq, Lk),
            lambda p, blk, ql, kl: (blk * batch_split + p, 0, 0, 0)))
    if need_block_out:
        out_shape.append(jax.ShapeDtypeStruct((n_blocks * B, Lq, Dq), jnp.float32))
        out_specs.append(pl.BlockSpec(
            (Bp, Lq, Dq),
            lambda p, blk, ql, kl: (blk * batch_split + p, 0, 0)))

    kernel = functools.partial(
        _fft_stack_kernel, Bp=Bp, Lq=Lq, Lk=Lk, Dq=Dq, Dk=Dk, H=H, Dh=Dh, Dv=Dv,
        Ch=Ch, ksize=ksize, scale=1.0 / float(np.sqrt(Dh)),
        self_attn=self_attn, norm_first=meta["norm_first"],
        need_attn=need_attn, need_block_out=need_block_out)

    res = pl.pallas_call(
        kernel,
        out_shape=tuple(out_shape),
        grid_spec=pltpu.PrefetchScalarGridSpec(
            num_scalar_prefetch=2,
            grid=(batch_split, n_blocks),
            in_specs=in_specs,
            out_specs=tuple(out_specs)),
        # TODO(synk): set vmem_limit_bytes explicitly when scaled to realistic
        # TTS dims (v7x has 64 MiB physical VMEM / 32 MiB default scoped limit).
        compiler_params=pltpu.CompilerParams(
            dimension_semantics=("parallel", "arbitrary")),
    )(q_lens.astype(jnp.int32), k_lens.astype(jnp.int32), *inputs)

    if not isinstance(res, (list, tuple)):
        res = (res,)
    x_out = res[0]
    idx = 1
    attn_all = None
    if need_attn:
        attn_all = res[idx].reshape(n_blocks, B, H, Lq, Lk)
        idx += 1
    blkout_all = None
    if need_block_out:
        blkout_all = res[idx].reshape(n_blocks, B, Lq, Dq)
    return x_out, attn_all, blkout_all


# ----------------------------------------------------------------------------
# Tiny length-predictor attention (Lq=1, Dq_in=1): plain jnp/XLA, no kernel.
# ----------------------------------------------------------------------------

def jnp_attention(p, Xq, Xk, key_mask=None, need_attn=False):
    H, Dh, Dv = p["n_heads"], p["hid_dim"], p["out_dim_v"]
    B, Lq, _ = Xq.shape
    Lk = Xk.shape[1]
    q = jnp.einsum("bld,df->blf", Xq, p["wq"]) + p["bq"]
    k = jnp.einsum("bld,df->blf", Xk, p["wk"]) + p["bk"]
    v = jnp.einsum("bld,df->blf", Xk, p["wv"]) + p["bv"]
    q4 = q.reshape(B, Lq, H, Dh).transpose(0, 2, 1, 3)
    k4 = k.reshape(B, Lk, H, Dh).transpose(0, 2, 1, 3)
    v4 = v.reshape(B, Lk, H, Dv).transpose(0, 2, 1, 3)
    s = jnp.einsum("bhqd,bhkd->bhqk", q4, k4) / np.sqrt(Dh)
    if key_mask is not None:
        s = jnp.where(key_mask[:, None, None, :] > 0.5, _NEG_FILL, s)
    pr = jax.nn.softmax(s, axis=-1)
    o = jnp.einsum("bhqk,bhkd->bhqd", pr, v4)
    o = o.transpose(0, 2, 1, 3).reshape(B, Lq, H * Dv)
    out = jnp.einsum("bld,do->blo", o, p["wo"]) + p["bo"]
    return out, (pr if need_attn else None)


# ----------------------------------------------------------------------------
# Parameter init (deterministic, PyTorch-like uniform fan-in init)
# ----------------------------------------------------------------------------

def _uniform(key, shape, bound):
    return jax.random.uniform(key, shape, jnp.float32, -bound, bound)


def make_pos_encoding(max_seq_len, max_in_dim):
    pos = np.arange(max_seq_len)[:, None].astype(np.float32)
    i = np.arange(max_in_dim)[None, :].astype(np.float32)
    angle = pos / np.power(10000.0, (2.0 * np.floor(i / 2.0)) / max_in_dim)
    pe = np.zeros((max_seq_len, max_in_dim), np.float32)
    pe[:, 0::2] = np.sin(angle[:, 0::2])
    pe[:, 1::2] = np.cos(angle[:, 1::2])
    return jnp.asarray(pe)


def pos_encode(pe, x):
    _, L, D = x.shape
    return x + pe[:L, :D][None]


def get_mask_of_lengths(lens, max_len):
    pos = jnp.arange(max_len)[None, :]
    return (pos >= lens[:, None]).astype(jnp.float32)   # 1.0 = padded


def init_fft_stack(key, n_blocks, in_dim, att_hid_dim, conv_hid_dim, conv_k_size,
                   att_n_heads=1, att_in_dim_k=None, att_out_dim_v=None,
                   norm_first=True):
    """Stacked (leading dim = n_blocks) parameters for a fused FFT-block stack.

    Conv weight row j*in_dim+ci of "w" corresponds to torch Conv1d weight[co, ci, j].
    Matmul weights are stored bf16 (MXU operand dtype); biases / LN stay f32.
    """
    D = in_dim
    Dk = D if att_in_dim_k is None else att_in_dim_k
    Dh = att_hid_dim
    Dv = Dh if att_out_dim_v is None else att_out_dim_v
    H, Ch, ksz = att_n_heads, conv_hid_dim, conv_k_size
    ks = jax.random.split(key, 12)
    bd_q, bd_k = 1.0 / np.sqrt(D), 1.0 / np.sqrt(Dk)
    bd_o = 1.0 / np.sqrt(H * Dv)
    bd_c1, bd_c2 = 1.0 / np.sqrt(D * ksz), 1.0 / np.sqrt(Ch * ksz)
    return {
        "ln1_g": jnp.ones((n_blocks, 1, D), jnp.float32),
        "ln1_b": jnp.zeros((n_blocks, 1, D), jnp.float32),
        "wq": _uniform(ks[0], (n_blocks, D, H * Dh), bd_q).astype(_MM_DTYPE),
        "bq": _uniform(ks[1], (n_blocks, 1, H * Dh), bd_q),
        "wk": _uniform(ks[2], (n_blocks, Dk, H * Dh), bd_k).astype(_MM_DTYPE),
        "bk": _uniform(ks[3], (n_blocks, 1, H * Dh), bd_k),
        "wv": _uniform(ks[4], (n_blocks, Dk, H * Dv), bd_k).astype(_MM_DTYPE),
        "bv": _uniform(ks[5], (n_blocks, 1, H * Dv), bd_k),
        "wo": _uniform(ks[6], (n_blocks, H * Dv, D), bd_o).astype(_MM_DTYPE),
        "bo": _uniform(ks[7], (n_blocks, 1, D), bd_o),
        "ln2_g": jnp.ones((n_blocks, 1, D), jnp.float32),
        "ln2_b": jnp.zeros((n_blocks, 1, D), jnp.float32),
        "w1": _uniform(ks[8], (n_blocks, ksz * D, Ch), bd_c1).astype(_MM_DTYPE),
        "b1": _uniform(ks[9], (n_blocks, 1, Ch), bd_c1),
        "w2": _uniform(ks[10], (n_blocks, ksz * Ch, D), bd_c2).astype(_MM_DTYPE),
        "b2": _uniform(ks[11], (n_blocks, 1, D), bd_c2),
        "meta": {"n_heads": H, "hid_dim": Dh, "out_dim_v": Dv, "ksize": ksz,
                 "conv_hid": Ch, "norm_first": norm_first},
    }


def init_attention_params(key, in_dim_q, hid_dim, n_heads=1, in_dim_k=None,
                          out_dim_v=None, out_dim_o=None):
    in_dim_k = in_dim_q if in_dim_k is None else in_dim_k
    out_dim_v = hid_dim if out_dim_v is None else out_dim_v
    out_dim_o = in_dim_q if out_dim_o is None else out_dim_o
    ks = jax.random.split(key, 8)
    bq, bk = 1.0 / np.sqrt(in_dim_q), 1.0 / np.sqrt(in_dim_k)
    bo = 1.0 / np.sqrt(n_heads * out_dim_v)
    return {"wq": _uniform(ks[0], (in_dim_q, n_heads * hid_dim), bq),
            "bq": _uniform(ks[1], (1, n_heads * hid_dim), bq),
            "wk": _uniform(ks[2], (in_dim_k, n_heads * hid_dim), bk),
            "bk": _uniform(ks[3], (1, n_heads * hid_dim), bk),
            "wv": _uniform(ks[4], (in_dim_k, n_heads * out_dim_v), bk),
            "bv": _uniform(ks[5], (1, n_heads * out_dim_v), bk),
            "wo": _uniform(ks[6], (n_heads * out_dim_v, out_dim_o), bo),
            "bo": _uniform(ks[7], (1, out_dim_o), bo),
            "n_heads": n_heads, "hid_dim": hid_dim, "out_dim_v": out_dim_v}


def init_vformer(key, len_limit, seq_dim, cd_n_blocks, cd_att_hid_dim,
                 cd_conv_hid_dim, cd_conv_k_size, lr_att_hid_dim, lr_conv_hid_dim,
                 lr_conv_k_size, cd_att_n_heads=(1, 1), lr_att_n_heads=(1, 1)):
    k_enc, k_dec, k_lp, k_st = jax.random.split(key, 4)
    return {
        "pe": make_pos_encoding(max(len_limit), max(seq_dim)),
        "encoder": init_fft_stack(k_enc, cd_n_blocks[0], seq_dim[0],
                                  cd_att_hid_dim[0], cd_conv_hid_dim[0],
                                  cd_conv_k_size[0], cd_att_n_heads[0]),
        "decoder": init_fft_stack(k_dec, cd_n_blocks[1], seq_dim[1],
                                  cd_att_hid_dim[1], cd_conv_hid_dim[1],
                                  cd_conv_k_size[1], cd_att_n_heads[1]),
        "len_predictor": init_attention_params(k_lp, in_dim_q=1,
                                               hid_dim=lr_att_hid_dim[0],
                                               n_heads=lr_att_n_heads[0],
                                               in_dim_k=seq_dim[0], out_dim_o=1),
        "seq_translator": init_fft_stack(k_st, 1, seq_dim[1], lr_att_hid_dim[1],
                                         lr_conv_hid_dim[1], lr_conv_k_size[1],
                                         lr_att_n_heads[1],
                                         att_in_dim_k=seq_dim[0]),
        "len_limit": len_limit, "seq_dim": seq_dim,
    }


# ----------------------------------------------------------------------------
# Model forward (thin JAX glue around the fused Pallas stack kernels)
# ----------------------------------------------------------------------------

def _run_coder(stack, Xq, lens, need_attn_idx, need_blkout_idx):
    need_attn = len(need_attn_idx) > 0
    need_bo = any(i >= 0 for i in need_blkout_idx)
    x, attn_all, blkout_all = pallas_fft_stack(stack, Xq, q_lens=lens, k_lens=lens,
                                               Xk=None, need_attn=need_attn,
                                               need_block_out=need_bo)
    attn_dict = {i: attn_all[i] for i in need_attn_idx} if need_attn else {}
    bo_dict = {}
    if -1 in need_blkout_idx:
        bo_dict[-1] = Xq
    if need_bo:
        for i in need_blkout_idx:
            if i >= 0:
                bo_dict[i] = blkout_all[i]
    return x, attn_dict, bo_dict


def vformer_forward(params, X_A, A_lens, B_lens=None,
                    cd_need_attns=((), ()), cd_need_block_outs=((), ()),
                    lr_need_attns=(False, False), pos_enc_input=True):
    len_limit = params["len_limit"]
    seq_dim = params["seq_dim"]
    B, A_max_len, _ = X_A.shape
    # TODO(synk): torch's `X_A[:, self.len_limit[0]]` truncation indexes a single
    # timestep (likely a bug); here we assume seq_len_A <= len_limit[0].
    A_lens = jnp.minimum(A_lens, len_limit[0]).astype(jnp.int32)

    if pos_enc_input:
        X_A = pos_encode(params["pe"], X_A)

    X_A_enc, enc_attns, enc_outs = _run_coder(
        params["encoder"], X_A, A_lens, cd_need_attns[0], cd_need_block_outs[0])

    # Length predictor: tiny (1x1-query) attention -> plain XLA, no kernel launch.
    A_mask = get_mask_of_lengths(A_lens, A_max_len)
    ones_q = jnp.ones((B, 1, 1), jnp.float32)
    B_lens_pred, len_attn = jnp_attention(params["len_predictor"], ones_q, X_A_enc,
                                          key_mask=A_mask,
                                          need_attn=lr_need_attns[0])
    B_lens_pred = B_lens_pred.reshape(B)

    if B_lens is None:
        B_lens = jnp.clip(jnp.exp(B_lens_pred), 1, len_limit[1]).astype(jnp.int32)
    else:
        B_lens = jnp.minimum(B_lens, len_limit[1]).astype(jnp.int32)
    # TODO(synk): torch uses B_max_len = max(B_lens).item(); kept static
    # (= len_limit[1]) to avoid device->host sync / per-shape recompiles.
    B_max_len = int(len_limit[1])

    X_B = pos_encode(params["pe"],
                     jnp.zeros((B, B_max_len, seq_dim[1]), jnp.float32))
    X_B, st_attn_all, _ = pallas_fft_stack(params["seq_translator"], X_B,
                                           q_lens=B_lens, k_lens=A_lens, Xk=X_A_enc,
                                           need_attn=lr_need_attns[1],
                                           need_block_out=False)
    seq_attn = st_attn_all[0] if lr_need_attns[1] else None
    X_B = pos_encode(params["pe"], X_B)

    X_B, dec_attns, dec_outs = _run_coder(
        params["decoder"], X_B, B_lens, cd_need_attns[1], cd_need_block_outs[1])

    cd_attns = {"encoder": enc_attns, "decoder": dec_attns}
    cd_block_outs = {"encoder": enc_outs, "decoder": dec_outs}
    lr_attns = {"len_predictor": len_attn, "seq_translator": seq_attn}
    return X_B, B_lens, B_lens_pred, cd_attns, cd_block_outs, lr_attns


# ----------------------------------------------------------------------------
if __name__ == "__main__":
    key = jax.random.PRNGKey(0)
    k_param, k_x = jax.random.split(key)

    len_limit = (16, 12)
    seq_dim = (16, 16)
    params = init_vformer(
        k_param, len_limit=len_limit, seq_dim=seq_dim,
        cd_n_blocks=(2, 2), cd_att_hid_dim=(16, 16),
        cd_conv_hid_dim=(32, 32), cd_conv_k_size=(3, 3),
        lr_att_hid_dim=(16, 16), lr_conv_hid_dim=(32, 32),
        lr_conv_k_size=(3, 3), cd_att_n_heads=(2, 2), lr_att_n_heads=(1, 1))

    batch, LA = 2, 12
    X_A = jax.random.normal(k_x, (batch, LA, seq_dim[0]), jnp.float32)
    A_lens = jnp.array([12, 9], jnp.int32)
    B_lens = jnp.array([10, 7], jnp.int32)

    X_B, B_lens_out, B_lens_pred, cd_attns, cd_block_outs, lr_attns = \
        vformer_forward(params, X_A, A_lens, B_lens,
                        lr_need_attns=(True, True))

    jax.block_until_ready((X_B, B_lens_out, B_lens_pred,
                           lr_attns["len_predictor"],
                           lr_attns["seq_translator"]))

    assert X_B.shape == (batch, len_limit[1], seq_dim[1])
    assert B_lens_pred.shape == (batch,)
    assert lr_attns["len_predictor"].shape == (batch, 1, 1, LA)
    assert lr_attns["seq_translator"].shape == (batch, 1, len_limit[1], LA)
    assert bool(jnp.all(jnp.isfinite(X_B)))
    assert bool(jnp.all(jnp.isfinite(B_lens_pred)))
    assert bool(jnp.all(jnp.isfinite(lr_attns["len_predictor"])))
    assert bool(jnp.all(jnp.isfinite(lr_attns["seq_translator"])))
    print("KERNEL_OK")
</pallas_src>

<mosaic_0001>
module attributes {stable_mosaic.version = 11 : i64} {
  func.func @_fft_stack_kernel(%arg0: i32, %arg1: i32, %arg2: memref<2xi32, #tpu.memory_space<smem>>, %arg3: memref<2xi32, #tpu.memory_space<smem>>, %arg4: memref<1x12x16xf32, #tpu.memory_space<vmem>>, %arg5: memref<1x1x16xf32, #tpu.memory_space<vmem>>, %arg6: memref<1x1x16xf32, #tpu.memory_space<vmem>>, %arg7: memref<1x16x32xbf16, #tpu.memory_space<vmem>>, %arg8: memref<1x1x32xf32, #tpu.memory_space<vmem>>, %arg9: memref<1x16x32xbf16, #tpu.memory_space<vmem>>, %arg10: memref<1x1x32xf32, #tpu.memory_space<vmem>>, %arg11: memref<1x16x32xbf16, #tpu.memory_space<vmem>>, %arg12: memref<1x1x32xf32, #tpu.memory_space<vmem>>, %arg13: memref<1x32x16xbf16, #tpu.memory_space<vmem>>, %arg14: memref<1x1x16xf32, #tpu.memory_space<vmem>>, %arg15: memref<1x1x16xf32, #tpu.memory_space<vmem>>, %arg16: memref<1x1x16xf32, #tpu.memory_space<vmem>>, %arg17: memref<1x48x32xbf16, #tpu.memory_space<vmem>>, %arg18: memref<1x1x32xf32, #tpu.memory_space<vmem>>, %arg19: memref<1x96x16xbf16, #tpu.memory_space<vmem>>, %arg20: memref<1x1x16xf32, #tpu.memory_space<vmem>>, %arg21: memref<1x12x16xf32, #tpu.memory_space<vmem>>) attributes {dimension_semantics = [#tpu.dimension_semantics<parallel>, #tpu.dimension_semantics<arbitrary>], iteration_bounds = array<i64: 2, 2>, scalar_prefetch = 2 : i64, scratch_operands = 0 : i64, tpu.core_type = #tpu.core_type<tc>, window_params = [{transform_indices = @transform_0, window_bounds = array<i64: 1, 12, 16>}, {transform_indices = @transform_1, window_bounds = array<i64: 1, 1, 16>}, {transform_indices = @transform_2, window_bounds = array<i64: 1, 1, 16>}, {transform_indices = @transform_3, window_bounds = array<i64: 1, 16, 32>}, {transform_indices = @transform_4, window_bounds = array<i64: 1, 1, 32>}, {transform_indices = @transform_5, window_bounds = array<i64: 1, 16, 32>}, {transform_indices = @transform_6, window_bounds = array<i64: 1, 1, 32>}, {transform_indices = @transform_7, window_bounds = array<i64: 1, 16, 32>}, {transform_indices = @transform_8, window_bounds = array<i64: 1, 1, 32>}, {transform_indices = @transform_9, window_bounds = array<i64: 1, 32, 16>}, {transform_indices = @transform_10, window_bounds = array<i64: 1, 1, 16>}, {transform_indices = @transform_11, window_bounds = array<i64: 1, 1, 16>}, {transform_indices = @transform_12, window_bounds = array<i64: 1, 1, 16>}, {transform_indices = @transform_13, window_bounds = array<i64: 1, 48, 32>}, {transform_indices = @transform_14, window_bounds = array<i64: 1, 1, 32>}, {transform_indices = @transform_15, window_bounds = array<i64: 1, 96, 16>}, {transform_indices = @transform_16, window_bounds = array<i64: 1, 1, 16>}, {transform_indices = @transform_17, window_bounds = array<i64: 1, 12, 16>}]} {
    %c0_i32 = arith.constant 0 : i32
    %0 = arith.cmpi eq, %arg1, %c0_i32 : i32
    %1 = arith.extui %0 : i1 to i32
    %c0_i32_0 = arith.constant 0 : i32
    %2 = arith.cmpi ne, %1, %c0_i32_0 : i32
    scf.if %2 {
      %c0_94 = arith.constant 0 : index
      %c0_95 = arith.constant 0 : index
      %c0_96 = arith.constant 0 : index
      %221 = vector.load %arg4[%c0_94, %c0_95, %c0_96] : memref<1x12x16xf32, #tpu.memory_space<vmem>>, vector<1x12x16xf32>
      %c0_97 = arith.constant 0 : index
      %c0_98 = arith.constant 0 : index
      %c0_99 = arith.constant 0 : index
      %222 = vector.load %arg21[%c0_97, %c0_98, %c0_99] : memref<1x12x16xf32, #tpu.memory_space<vmem>>, vector<1x12x16xf32>
      tpu.vector_store %arg21[%c0_97, %c0_98, %c0_99], %221 {strides = array<i32>} : memref<1x12x16xf32, #tpu.memory_space<vmem>>, vector<1x12x16xf32>,
    } else {
    }
    %c0 = arith.constant 0 : index
    %c0_1 = arith.constant 0 : index
    %c0_2 = arith.constant 0 : index
    %3 = vector.load %arg21[%c0, %c0_1, %c0_2] : memref<1x12x16xf32, #tpu.memory_space<vmem>>, vector<1x12x16xf32>
    %c1_i32 = arith.constant 1 : i32
    %4 = arith.muli %arg0, %c1_i32 : i32
    %5 = tpu.iota {dimensions = array<i32: 2>} : vector<1x1x12xi32>
    %6 = tpu.iota {dimensions = array<i32: 1>} : vector<1x12x1xi32>
    %c0_i32_3 = arith.constant 0 : i32
    %7 = arith.addi %4, %c0_i32_3 : i32
    %8 = arith.index_cast %7 : i32 to index
    %9 = memref.load %arg3[%8] : memref<2xi32, #tpu.memory_space<smem>>
    %10 = vector.broadcast %9 : i32 to vector<1x1x12xi32>
    %11 = arith.cmpi sge, %5, %10 : vector<1x1x12xi32>
    %12 = arith.extui %11 : vector<1x1x12xi1> to vector<1x1x12xi32>
    %13 = arith.sitofp %12 : vector<1x1x12xi32> to vector<1x1x12xf32>
    %c0_i32_4 = arith.constant 0 : i32
    %14 = arith.addi %4, %c0_i32_4 : i32
    %15 = arith.index_cast %14 : i32 to index
    %16 = memref.load %arg2[%15] : memref<2xi32, #tpu.memory_space<smem>>
    %17 = vector.broadcast %16 : i32 to vector<1x12x1xi32>
    %18 = arith.cmpi sge, %6, %17 : vector<1x12x1xi32>
    %19 = arith.extui %18 : vector<1x12x1xi1> to vector<1x12x1xi32>
    %20 = arith.sitofp %19 : vector<1x12x1xi32> to vector<1x12x1xf32>
    %c0_5 = arith.constant 0 : index
    %c0_6 = arith.constant 0 : index
    %c0_7 = arith.constant 0 : index
    %21 = vector.load %arg5[%c0_5, %c0_6, %c0_7] : memref<1x1x16xf32, #tpu.memory_space<vmem>>, vector<1x1x16xf32>
    %22 = vector.shape_cast %21 : vector<1x1x16xf32> to vector<1x16xf32>
    %c0_8 = arith.constant 0 : index
    %c0_9 = arith.constant 0 : index
    %c0_10 = arith.constant 0 : index
    %23 = vector.load %arg6[%c0_8, %c0_9, %c0_10] : memref<1x1x16xf32, #tpu.memory_space<vmem>>, vector<1x1x16xf32>
    %24 = vector.shape_cast %23 : vector<1x1x16xf32> to vector<1x16xf32>
    %c0_11 = arith.constant 0 : index
    %c0_12 = arith.constant 0 : index
    %c0_13 = arith.constant 0 : index
    %25 = vector.load %arg15[%c0_11, %c0_12, %c0_13] : memref<1x1x16xf32, #tpu.memory_space<vmem>>, vector<1x1x16xf32>
    %26 = vector.shape_cast %25 : vector<1x1x16xf32> to vector<1x16xf32>
    %c0_14 = arith.constant 0 : index
    %c0_15 = arith.constant 0 : index
    %c0_16 = arith.constant 0 : index
    %27 = vector.load %arg16[%c0_14, %c0_15, %c0_16] : memref<1x1x16xf32, #tpu.memory_space<vmem>>, vector<1x1x16xf32>
    %28 = vector.shape_cast %27 : vector<1x1x16xf32> to vector<1x16xf32>
    %cst = arith.constant dense<0.000000e+00> : vector<1x12xf32>
    %29 = vector.multi_reduction <add>, %3, %cst [2] : vector<1x12x16xf32> to vector<1x12xf32>
    %30 = vector.shape_cast %29 : vector<1x12xf32> to vector<1x12x1xf32>
    %cst_17 = arith.constant 1.600000e+01 : f32
    %31 = vector.broadcast %cst_17 : f32 to vector<1x12x1xf32>
    %32 = arith.divf %30, %31 : vector<1x12x1xf32>
    %33 = vector.broadcast %32 : vector<1x12x1xf32> to vector<1x12x16xf32>
    %34 = arith.subf %3, %33 : vector<1x12x16xf32>
    %35 = arith.mulf %34, %34 : vector<1x12x16xf32>
    %cst_18 = arith.constant dense<0.000000e+00> : vector<1x12xf32>
    %36 = vector.multi_reduction <add>, %35, %cst_18 [2] : vector<1x12x16xf32> to vector<1x12xf32>
    %37 = vector.shape_cast %36 : vector<1x12xf32> to vector<1x12x1xf32>
    %cst_19 = arith.constant 1.600000e+01 : f32
    %38 = vector.broadcast %cst_19 : f32 to vector<1x12x1xf32>
    %39 = arith.divf %37, %38 : vector<1x12x1xf32>
    %40 = vector.broadcast %32 : vector<1x12x1xf32> to vector<1x12x16xf32>
    %41 = arith.subf %3, %40 : vector<1x12x16xf32>
    %cst_20 = arith.constant 9.99999974E-6 : f32
    %42 = vector.broadcast %cst_20 : f32 to vector<1x12x1xf32>
    %43 = arith.addf %39, %42 : vector<1x12x1xf32>
    %44 = math.rsqrt %43 : vector<1x12x1xf32>
    %45 = vector.broadcast %44 : vector<1x12x1xf32> to vector<1x12x16xf32>
    %46 = arith.mulf %41, %45 : vector<1x12x16xf32>
    %47 = vector.shape_cast %22 : vector<1x16xf32> to vector<1x1x16xf32>
    %48 = vector.broadcast %47 : vector<1x1x16xf32> to vector<1x12x16xf32>
    %49 = arith.mulf %46, %48 : vector<1x12x16xf32>
    %50 = vector.shape_cast %24 : vector<1x16xf32> to vector<1x1x16xf32>
    %51 = vector.broadcast %50 : vector<1x1x16xf32> to vector<1x12x16xf32>
    %52 = arith.addf %49, %51 : vector<1x12x16xf32>
    %53 = vector.shape_cast %52 : vector<1x12x16xf32> to vector<12x16xf32>
    %c0_21 = arith.constant 0 : index
    %c0_22 = arith.constant 0 : index
    %c0_23 = arith.constant 0 : index
    %54 = vector.load %arg7[%c0_21, %c0_22, %c0_23] : memref<1x16x32xbf16, #tpu.memory_space<vmem>>, vector<1x16x32xbf16>
    %55 = vector.shape_cast %54 : vector<1x16x32xbf16> to vector<16x32xbf16>
    %56 = arith.truncf %53 : vector<12x16xf32> to vector<12x16xbf16>
    %cst_24 = arith.constant dense<0.000000e+00> : vector<12x32xf32>
    %57 = tpu.matmul %56, %55, %cst_24 {dimension_numbers = #tpu.dot_dimension_numbers<[1], [0], [0], [1], [0, 0, 1, 1], [], []>} : vector<12x16xbf16>, vector<16x32xbf16>, vector<12x32xf32> -> vector<12x32xf32>
    %c0_25 = arith.constant 0 : index
    %c0_26 = arith.constant 0 : index
    %c0_27 = arith.constant 0 : index
    %58 = vector.load %arg8[%c0_25, %c0_26, %c0_27] : memref<1x1x32xf32, #tpu.memory_space<vmem>>, vector<1x1x32xf32>
    %59 = vector.shape_cast %58 : vector<1x1x32xf32> to vector<1x32xf32>
    %60 = vector.broadcast %59 : vector<1x32xf32> to vector<12x32xf32>
    %61 = arith.addf %57, %60 : vector<12x32xf32>
    %62 = vector.shape_cast %52 : vector<1x12x16xf32> to vector<12x16xf32>
    %c0_28 = arith.constant 0 : index
    %c0_29 = arith.constant 0 : index
    %c0_30 = arith.constant 0 : index
    %63 = vector.load %arg9[%c0_28, %c0_29, %c0_30] : memref<1x16x32xbf16, #tpu.memory_space<vmem>>, vector<1x16x32xbf16>
    %64 = vector.shape_cast %63 : vector<1x16x32xbf16> to vector<16x32xbf16>
    %65 = arith.truncf %62 : vector<12x16xf32> to vector<12x16xbf16>
    %cst_31 = arith.constant dense<0.000000e+00> : vector<12x32xf32>
    %66 = tpu.matmul %65, %64, %cst_31 {dimension_numbers = #tpu.dot_dimension_numbers<[1], [0], [0], [1], [0, 0, 1, 1], [], []>} : vector<12x16xbf16>, vector<16x32xbf16>, vector<12x32xf32> -> vector<12x32xf32>
    %c0_32 = arith.constant 0 : index
    %c0_33 = arith.constant 0 : index
    %c0_34 = arith.constant 0 : index
    %67 = vector.load %arg10[%c0_32, %c0_33, %c0_34] : memref<1x1x32xf32, #tpu.memory_space<vmem>>, vector<1x1x32xf32>
    %68 = vector.shape_cast %67 : vector<1x1x32xf32> to vector<1x32xf32>
    %69 = vector.broadcast %68 : vector<1x32xf32> to vector<12x32xf32>
    %70 = arith.addf %66, %69 : vector<12x32xf32>
    %71 = vector.shape_cast %52 : vector<1x12x16xf32> to vector<12x16xf32>
    %c0_35 = arith.constant 0 : index
    %c0_36 = arith.constant 0 : index
    %c0_37 = arith.constant 0 : index
    %72 = vector.load %arg11[%c0_35, %c0_36, %c0_37] : memref<1x16x32xbf16, #tpu.memory_space<vmem>>, vector<1x16x32xbf16>
    %73 = vector.shape_cast %72 : vector<1x16x32xbf16> to vector<16x32xbf16>
    %74 = arith.truncf %71 : vector<12x16xf32> to vector<12x16xbf16>
    %cst_38 = arith.constant dense<0.000000e+00> : vector<12x32xf32>
    %75 = tpu.matmul %74, %73, %cst_38 {dimension_numbers = #tpu.dot_dimension_numbers<[1], [0], [0], [1], [0, 0, 1, 1], [], []>} : vector<12x16xbf16>, vector<16x32xbf16>, vector<12x32xf32> -> vector<12x32xf32>
    %c0_39 = arith.constant 0 : index
    %c0_40 = arith.constant 0 : index
    %c0_41 = arith.constant 0 : index
    %76 = vector.load %arg12[%c0_39, %c0_40, %c0_41] : memref<1x1x32xf32, #tpu.memory_space<vmem>>, vector<1x1x32xf32>
    %77 = vector.shape_cast %76 : vector<1x1x32xf32> to vector<1x32xf32>
    %78 = vector.broadcast %77 : vector<1x32xf32> to vector<12x32xf32>
    %79 = arith.addf %75, %78 : vector<12x32xf32>
    %80 = vector.shape_cast %61 : vector<12x32xf32> to vector<1x12x32xf32>
    %81 = vector.shape_cast %70 : vector<12x32xf32> to vector<1x12x32xf32>
    %82 = vector.shape_cast %79 : vector<12x32xf32> to vector<1x12x32xf32>
    %83 = vector.extract_strided_slice %80 {offsets = [0, 0, 0], sizes = [1, 12, 16], strides = [1, 1, 1]} : vector<1x12x32xf32> to vector<1x12x16xf32>
    %84 = vector.extract_strided_slice %81 {offsets = [0, 0, 0], sizes = [1, 12, 16], strides = [1, 1, 1]} : vector<1x12x32xf32> to vector<1x12x16xf32>
    %85 = vector.extract_strided_slice %82 {offsets = [0, 0, 0], sizes = [1, 12, 16], strides = [1, 1, 1]} : vector<1x12x32xf32> to vector<1x12x16xf32>
    %86 = arith.truncf %83 : vector<1x12x16xf32> to vector<1x12x16xbf16>
    %87 = arith.truncf %84 : vector<1x12x16xf32> to vector<1x12x16xbf16>
    %cst_42 = arith.constant dense<0.000000e+00> : vector<1x12x12xf32>
    %88 = tpu.matmul %86, %87, %cst_42 {dimension_numbers = #tpu.dot_dimension_numbers<[2], [2], [1], [1], [0, 0, 0, 1, 1, 1], [0], [0]>} : vector<1x12x16xbf16>, vector<1x12x16xbf16>, vector<1x12x12xf32> -> vector<1x12x12xf32>
    %cst_43 = arith.constant 2.500000e-01 : f32
    %89 = vector.broadcast %cst_43 : f32 to vector<1x12x12xf32>
    %90 = arith.mulf %88, %89 : vector<1x12x12xf32>
    %cst_44 = arith.constant 5.000000e-01 : f32
    %91 = vector.broadcast %cst_44 : f32 to vector<1x1x12xf32>
    %92 = arith.cmpf ogt, %13, %91 : vector<1x1x12xf32>
    %cst_45 = arith.constant -1.000000e+30 : f32
    %93 = vector.shape_cast %92 : vector<1x1x12xi1> to vector<1x1x12xi1>
    %94 = vector.broadcast %93 : vector<1x1x12xi1> to vector<1x12x12xi1>
    %95 = vector.broadcast %cst_45 : f32 to vector<1x12x12xf32>
    %96 = arith.select %94, %95, %90 : vector<1x12x12xi1>, vector<1x12x12xf32>
    %cst_46 = arith.constant dense<0xFF800000> : vector<1x12xf32>
    %97 = vector.multi_reduction <maximumf>, %96, %cst_46 [2] : vector<1x12x12xf32> to vector<1x12xf32>
    %98 = vector.shape_cast %97 : vector<1x12xf32> to vector<1x12x1xf32>
    %99 = vector.broadcast %98 : vector<1x12x1xf32> to vector<1x12x12xf32>
    %100 = arith.subf %96, %99 : vector<1x12x12xf32>
    %101 = math.exp %100 : vector<1x12x12xf32>
    %cst_47 = arith.constant dense<0.000000e+00> : vector<1x12xf32>
    %102 = vector.multi_reduction <add>, %101, %cst_47 [2] : vector<1x12x12xf32> to vector<1x12xf32>
    %103 = vector.shape_cast %102 : vector<1x12xf32> to vector<1x12x1xf32>
    %104 = vector.broadcast %103 : vector<1x12x1xf32> to vector<1x12x12xf32>
    %105 = arith.divf %101, %104 : vector<1x12x12xf32>
    %cst_48 = arith.constant 5.000000e-01 : f32
    %106 = vector.broadcast %cst_48 : f32 to vector<1x12x1xf32>
    %107 = arith.cmpf ogt, %20, %106 : vector<1x12x1xf32>
    %cst_49 = arith.constant 0.000000e+00 : f32
    %108 = vector.shape_cast %107 : vector<1x12x1xi1> to vector<1x12x1xi1>
    %109 = vector.broadcast %108 : vector<1x12x1xi1> to vector<1x12x12xi1>
    %110 = vector.broadcast %cst_49 : f32 to vector<1x12x12xf32>
    %111 = arith.select %109, %110, %105 : vector<1x12x12xi1>, vector<1x12x12xf32>
    %112 = arith.truncf %111 : vector<1x12x12xf32> to vector<1x12x12xbf16>
    %113 = arith.truncf %85 : vector<1x12x16xf32> to vector<1x12x16xbf16>
    %cst_50 = arith.constant dense<0.000000e+00> : vector<1x12x16xf32>
    %114 = tpu.matmul %112, %113, %cst_50 {dimension_numbers = #tpu.dot_dimension_numbers<[2], [1], [1], [2], [0, 0, 0, 1, 1, 2], [0], [0]>} : vector<1x12x12xbf16>, vector<1x12x16xbf16>, vector<1x12x16xf32> -> vector<1x12x16xf32>
    %115 = vector.extract_strided_slice %80 {offsets = [0, 0, 16], sizes = [1, 12, 16], strides = [1, 1, 1]} : vector<1x12x32xf32> to vector<1x12x16xf32>
    %116 = vector.extract_strided_slice %81 {offsets = [0, 0, 16], sizes = [1, 12, 16], strides = [1, 1, 1]} : vector<1x12x32xf32> to vector<1x12x16xf32>
    %117 = vector.extract_strided_slice %82 {offsets = [0, 0, 16], sizes = [1, 12, 16], strides = [1, 1, 1]} : vector<1x12x32xf32> to vector<1x12x16xf32>
    %118 = arith.truncf %115 : vector<1x12x16xf32> to vector<1x12x16xbf16>
    %119 = arith.truncf %116 : vector<1x12x16xf32> to vector<1x12x16xbf16>
    %cst_51 = arith.constant dense<0.000000e+00> : vector<1x12x12xf32>
    %120 = tpu.matmul %118, %119, %cst_51 {dimension_numbers = #tpu.dot_dimension_numbers<[2], [2], [1], [1], [0, 0, 0, 1, 1, 1], [0], [0]>} : vector<1x12x16xbf16>, vector<1x12x16xbf16>, vector<1x12x12xf32> -> vector<1x12x12xf32>
    %cst_52 = arith.constant 2.500000e-01 : f32
    %121 = vector.broadcast %cst_52 : f32 to vector<1x12x12xf32>
    %122 = arith.mulf %120, %121 : vector<1x12x12xf32>
    %cst_53 = arith.constant 5.000000e-01 : f32
    %123 = vector.broadcast %cst_53 : f32 to vector<1x1x12xf32>
    %124 = arith.cmpf ogt, %13, %123 : vector<1x1x12xf32>
    %cst_54 = arith.constant -1.000000e+30 : f32
    %125 = vector.shape_cast %124 : vector<1x1x12xi1> to vector<1x1x12xi1>
    %126 = vector.broadcast %125 : vector<1x1x12xi1> to vector<1x12x12xi1>
    %127 = vector.broadcast %cst_54 : f32 to vector<1x12x12xf32>
    %128 = arith.select %126, %127, %122 : vector<1x12x12xi1>, vector<1x12x12xf32>
    %cst_55 = arith.constant dense<0xFF800000> : vector<1x12xf32>
    %129 = vector.multi_reduction <maximumf>, %128, %cst_55 [2] : vector<1x12x12xf32> to vector<1x12xf32>
    %130 = vector.shape_cast %129 : vector<1x12xf32> to vector<1x12x1xf32>
    %131 = vector.broadcast %130 : vector<1x12x1xf32> to vector<1x12x12xf32>
    %132 = arith.subf %128, %131 : vector<1x12x12xf32>
    %133 = math.exp %132 : vector<1x12x12xf32>
    %cst_56 = arith.constant dense<0.000000e+00> : vector<1x12xf32>
    %134 = vector.multi_reduction <add>, %133, %cst_56 [2] : vector<1x12x12xf32> to vector<1x12xf32>
    %135 = vector.shape_cast %134 : vector<1x12xf32> to vector<1x12x1xf32>
    %136 = vector.broadcast %135 : vector<1x12x1xf32> to vector<1x12x12xf32>
    %137 = arith.divf %133, %136 : vector<1x12x12xf32>
    %cst_57 = arith.constant 5.000000e-01 : f32
    %138 = vector.broadcast %cst_57 : f32 to vector<1x12x1xf32>
    %139 = arith.cmpf ogt, %20, %138 : vector<1x12x1xf32>
    %cst_58 = arith.constant 0.000000e+00 : f32
    %140 = vector.shape_cast %139 : vector<1x12x1xi1> to vector<1x12x1xi1>
    %141 = vector.broadcast %140 : vector<1x12x1xi1> to vector<1x12x12xi1>
    %142 = vector.broadcast %cst_58 : f32 to vector<1x12x12xf32>
    %143 = arith.select %141, %142, %137 : vector<1x12x12xi1>, vector<1x12x12xf32>
    %144 = arith.truncf %143 : vector<1x12x12xf32> to vector<1x12x12xbf16>
    %145 = arith.truncf %117 : vector<1x12x16xf32> to vector<1x12x16xbf16>
    %cst_59 = arith.constant dense<0.000000e+00> : vector<1x12x16xf32>
    %146 = tpu.matmul %144, %145, %cst_59 {dimension_numbers = #tpu.dot_dimension_numbers<[2], [1], [1], [2], [0, 0, 0, 1, 1, 2], [0], [0]>} : vector<1x12x12xbf16>, vector<1x12x16xbf16>, vector<1x12x16xf32> -> vector<1x12x16xf32>
    %147 = tpu.concatenate %114, %146 in 2 : vector<1x12x16xf32>, vector<1x12x16xf32> -> vector<1x12x32xf32>
    %148 = vector.shape_cast %147 : vector<1x12x32xf32> to vector<12x32xf32>
    %c0_60 = arith.constant 0 : index
    %c0_61 = arith.constant 0 : index
    %c0_62 = arith.constant 0 : index
    %149 = vector.load %arg13[%c0_60, %c0_61, %c0_62] : memref<1x32x16xbf16, #tpu.memory_space<vmem>>, vector<1x32x16xbf16>
    %150 = vector.shape_cast %149 : vector<1x32x16xbf16> to vector<32x16xbf16>
    %151 = arith.truncf %148 : vector<12x32xf32> to vector<12x32xbf16>
    %cst_63 = arith.constant dense<0.000000e+00> : vector<12x16xf32>
    %152 = tpu.matmul %151, %150, %cst_63 {dimension_numbers = #tpu.dot_dimension_numbers<[1], [0], [0], [1], [0, 0, 1, 1], [], []>} : vector<12x32xbf16>, vector<32x16xbf16>, vector<12x16xf32> -> vector<12x16xf32>
    %c0_64 = arith.constant 0 : index
    %c0_65 = arith.constant 0 : index
    %c0_66 = arith.constant 0 : index
    %153 = vector.load %arg14[%c0_64, %c0_65, %c0_66] : memref<1x1x16xf32, #tpu.memory_space<vmem>>, vector<1x1x16xf32>
    %154 = vector.shape_cast %153 : vector<1x1x16xf32> to vector<1x16xf32>
    %155 = vector.broadcast %154 : vector<1x16xf32> to vector<12x16xf32>
    %156 = arith.addf %152, %155 : vector<12x16xf32>
    %157 = vector.shape_cast %156 : vector<12x16xf32> to vector<1x12x16xf32>
    %158 = arith.addf %3, %157 : vector<1x12x16xf32>
    %cst_67 = arith.constant dense<0.000000e+00> : vector<1x12xf32>
    %159 = vector.multi_reduction <add>, %158, %cst_67 [2] : vector<1x12x16xf32> to vector<1x12xf32>
    %160 = vector.shape_cast %159 : vector<1x12xf32> to vector<1x12x1xf32>
    %cst_68 = arith.constant 1.600000e+01 : f32
    %161 = vector.broadcast %cst_68 : f32 to vector<1x12x1xf32>
    %162 = arith.divf %160, %161 : vector<1x12x1xf32>
    %163 = vector.broadcast %162 : vector<1x12x1xf32> to vector<1x12x16xf32>
    %164 = arith.subf %158, %163 : vector<1x12x16xf32>
    %165 = arith.mulf %164, %164 : vector<1x12x16xf32>
    %cst_69 = arith.constant dense<0.000000e+00> : vector<1x12xf32>
    %166 = vector.multi_reduction <add>, %165, %cst_69 [2] : vector<1x12x16xf32> to vector<1x12xf32>
    %167 = vector.shape_cast %166 : vector<1x12xf32> to vector<1x12x1xf32>
    %cst_70 = arith.constant 1.600000e+01 : f32
    %168 = vector.broadcast %cst_70 : f32 to vector<1x12x1xf32>
    %169 = arith.divf %167, %168 : vector<1x12x1xf32>
    %170 = vector.broadcast %162 : vector<1x12x1xf32> to vector<1x12x16xf32>
    %171 = arith.subf %158, %170 : vector<1x12x16xf32>
    %cst_71 = arith.constant 9.99999974E-6 : f32
    %172 = vector.broadcast %cst_71 : f32 to vector<1x12x1xf32>
    %173 = arith.addf %169, %172 : vector<1x12x1xf32>
    %174 = math.rsqrt %173 : vector<1x12x1xf32>
    %175 = vector.broadcast %174 : vector<1x12x1xf32> to vector<1x12x16xf32>
    %176 = arith.mulf %171, %175 : vector<1x12x16xf32>
    %177 = vector.shape_cast %26 : vector<1x16xf32> to vector<1x1x16xf32>
    %178 = vector.broadcast %177 : vector<1x1x16xf32> to vector<1x12x16xf32>
    %179 = arith.mulf %176, %178 : vector<1x12x16xf32>
    %180 = vector.shape_cast %28 : vector<1x16xf32> to vector<1x1x16xf32>
    %181 = vector.broadcast %180 : vector<1x1x16xf32> to vector<1x12x16xf32>
    %182 = arith.addf %179, %181 : vector<1x12x16xf32>
    %cst_72 = arith.constant 0.000000e+00 : f32
    %183 = vector.broadcast %cst_72 : f32 to vector<1x1x16xf32>
    %184 = vector.extract_strided_slice %182 {offsets = [0, 0, 0], sizes = [1, 11, 16], strides = [1, 1, 1]} : vector<1x12x16xf32> to vector<1x11x16xf32>
    %185 = tpu.concatenate %183, %184 in 1 : vector<1x1x16xf32>, vector<1x11x16xf32> -> vector<1x12x16xf32>
    %cst_73 = arith.constant 0.000000e+00 : f32
    %186 = vector.broadcast %cst_73 : f32 to vector<1x1x16xf32>
    %187 = vector.extract_strided_slice %182 {offsets = [0, 1, 0], sizes = [1, 11, 16], strides = [1, 1, 1]} : vector<1x12x16xf32> to vector<1x11x16xf32>
    %188 = tpu.concatenate %187, %186 in 1 : vector<1x11x16xf32>, vector<1x1x16xf32> -> vector<1x12x16xf32>
    %189 = tpu.concatenate %185, %182, %188 in 2 : vector<1x12x16xf32>, vector<1x12x16xf32>, vector<1x12x16xf32> -> vector<1x12x48xf32>
    %190 = vector.shape_cast %189 : vector<1x12x48xf32> to vector<12x48xf32>
    %c0_74 = arith.constant 0 : index
    %c0_75 = arith.constant 0 : index
    %c0_76 = arith.constant 0 : index
    %191 = vector.load %arg17[%c0_74, %c0_75, %c0_76] : memref<1x48x32xbf16, #tpu.memory_space<vmem>>, vector<1x48x32xbf16>
    %192 = vector.shape_cast %191 : vector<1x48x32xbf16> to vector<48x32xbf16>
    %193 = arith.truncf %190 : vector<12x48xf32> to vector<12x48xbf16>
    %cst_77 = arith.constant dense<0.000000e+00> : vector<12x32xf32>
    %194 = tpu.matmul %193, %192, %cst_77 {dimension_numbers = #tpu.dot_dimension_numbers<[1], [0], [0], [1], [0, 0, 1, 1], [], []>} : vector<12x48xbf16>, vector<48x32xbf16>, vector<12x32xf32> -> vector<12x32xf32>
    %c0_78 = arith.constant 0 : index
    %c0_79 = arith.constant 0 : index
    %c0_80 = arith.constant 0 : index
    %195 = vector.load %arg18[%c0_78, %c0_79, %c0_80] : memref<1x1x32xf32, #tpu.memory_space<vmem>>, vector<1x1x32xf32>
    %196 = vector.shape_cast %195 : vector<1x1x32xf32> to vector<1x32xf32>
    %197 = vector.broadcast %196 : vector<1x32xf32> to vector<12x32xf32>
    %198 = arith.addf %194, %197 : vector<12x32xf32>
    %cst_81 = arith.constant 0.000000e+00 : f32
    %199 = vector.broadcast %cst_81 : f32 to vector<12x32xf32>
    %200 = arith.maximumf %198, %199 : vector<12x32xf32>
    %201 = vector.shape_cast %200 : vector<12x32xf32> to vector<1x12x32xf32>
    %cst_82 = arith.constant 0.000000e+00 : f32
    %202 = vector.broadcast %cst_82 : f32 to vector<1x1x32xf32>
    %203 = vector.extract_strided_slice %201 {offsets = [0, 0, 0], sizes = [1, 11, 32], strides = [1, 1, 1]} : vector<1x12x32xf32> to vector<1x11x32xf32>
    %204 = tpu.concatenate %202, %203 in 1 : vector<1x1x32xf32>, vector<1x11x32xf32> -> vector<1x12x32xf32>
    %cst_83 = arith.constant 0.000000e+00 : f32
    %205 = vector.broadcast %cst_83 : f32 to vector<1x1x32xf32>
    %206 = vector.extract_strided_slice %201 {offsets = [0, 1, 0], sizes = [1, 11, 32], strides = [1, 1, 1]} : vector<1x12x32xf32> to vector<1x11x32xf32>
    %207 = tpu.concatenate %206, %205 in 1 : vector<1x11x32xf32>, vector<1x1x32xf32> -> vector<1x12x32xf32>
    %208 = tpu.concatenate %204, %201, %207 in 2 : vector<1x12x32xf32>, vector<1x12x32xf32>, vector<1x12x32xf32> -> vector<1x12x96xf32>
    %209 = vector.shape_cast %208 : vector<1x12x96xf32> to vector<12x96xf32>
    %c0_84 = arith.constant 0 : index
    %c0_85 = arith.constant 0 : index
    %c0_86 = arith.constant 0 : index
    %210 = vector.load %arg19[%c0_84, %c0_85, %c0_86] : memref<1x96x16xbf16, #tpu.memory_space<vmem>>, vector<1x96x16xbf16>
    %211 = vector.shape_cast %210 : vector<1x96x16xbf16> to vector<96x16xbf16>
    %212 = arith.truncf %209 : vector<12x96xf32> to vector<12x96xbf16>
    %cst_87 = arith.constant dense<0.000000e+00> : vector<12x16xf32>
    %213 = tpu.matmul %212, %211, %cst_87 {dimension_numbers = #tpu.dot_dimension_numbers<[1], [0], [0], [1], [0, 0, 1, 1], [], []>} : vector<12x96xbf16>, vector<96x16xbf16>, vector<12x16xf32> -> vector<12x16xf32>
    %c0_88 = arith.constant 0 : index
    %c0_89 = arith.constant 0 : index
    %c0_90 = arith.constant 0 : index
    %214 = vector.load %arg20[%c0_88, %c0_89, %c0_90] : memref<1x1x16xf32, #tpu.memory_space<vmem>>, vector<1x1x16xf32>
    %215 = vector.shape_cast %214 : vector<1x1x16xf32> to vector<1x16xf32>
    %216 = vector.broadcast %215 : vector<1x16xf32> to vector<12x16xf32>
    %217 = arith.addf %213, %216 : vector<12x16xf32>
    %218 = vector.shape_cast %217 : vector<12x16xf32> to vector<1x12x16xf32>
    %219 = arith.addf %158, %218 : vector<1x12x16xf32>
    %c0_91 = arith.constant 0 : index
    %c0_92 = arith.constant 0 : index
    %c0_93 = arith.constant 0 : index
    %220 = vector.load %arg21[%c0_91, %c0_92, %c0_93] : memref<1x12x16xf32, #tpu.memory_space<vmem>>, vector<1x12x16xf32>
    tpu.vector_store %arg21[%c0_91, %c0_92, %c0_93], %219 {strides = array<i32>} : memref<1x12x16xf32, #tpu.memory_space<vmem>>, vector<1x12x16xf32>,
    return
  }
  func.func @transform_0(%arg0: i32, %arg1: i32, %arg2: memref<2xi32, #tpu.memory_space<smem>>, %arg3: memref<2xi32, #tpu.memory_space<smem>>) -> (i32, i32, i32) {
    %c0_i32 = arith.constant 0 : i32
    %c0_i32_0 = arith.constant 0 : i32
    %c0_i32_1 = arith.constant 0 : i32
    return %arg0, %c0_i32, %c0_i32_0 : i32, i32, i32
  }
  func.func @transform_1(%arg0: i32, %arg1: i32, %arg2: memref<2xi32, #tpu.memory_space<smem>>, %arg3: memref<2xi32, #tpu.memory_space<smem>>) -> (i32, i32, i32) {
    %c0_i32 = arith.constant 0 : i32
    %c0_i32_0 = arith.constant 0 : i32
    %c0_i32_1 = arith.constant 0 : i32
    return %arg1, %c0_i32, %c0_i32_0 : i32, i32, i32
  }
  func.func @transform_2(%arg0: i32, %arg1: i32, %arg2: memref<2xi32, #tpu.memory_space<smem>>, %arg3: memref<2xi32, #tpu.memory_space<smem>>) -> (i32, i32, i32) {
    %c0_i32 = arith.constant 0 : i32
    %c0_i32_0 = arith.constant 0 : i32
    %c0_i32_1 = arith.constant 0 : i32
    return %arg1, %c0_i32, %c0_i32_0 : i32, i32, i32
  }
  func.func @transform_3(%arg0: i32, %arg1: i32, %arg2: memref<2xi32, #tpu.memory_space<smem>>, %arg3: memref<2xi32, #tpu.memory_space<smem>>) -> (i32, i32, i32) {
    %c0_i32 = arith.constant 0 : i32
    %c0_i32_0 = arith.constant 0 : i32
    %c0_i32_1 = arith.constant 0 : i32
    return %arg1, %c0_i32, %c0_i32_0 : i32, i32, i32
  }
  func.func @transform_4(%arg0: i32, %arg1: i32, %arg2: memref<2xi32, #tpu.memory_space<smem>>, %arg3: memref<2xi32, #tpu.memory_space<smem>>) -> (i32, i32, i32) {
    %c0_i32 = arith.constant 0 : i32
    %c0_i32_0 = arith.constant 0 : i32
    %c0_i32_1 = arith.constant 0 : i32
    return %arg1, %c0_i32, %c0_i32_0 : i32, i32, i32
  }
  func.func @transform_5(%arg0: i32, %arg1: i32, %arg2: memref<2xi32, #tpu.memory_space<smem>>, %arg3: memref<2xi32, #tpu.memory_space<smem>>) -> (i32, i32, i32) {
    %c0_i32 = arith.constant 0 : i32
    %c0_i32_0 = arith.constant 0 : i32
    %c0_i32_1 = arith.constant 0 : i32
    return %arg1, %c0_i32, %c0_i32_0 : i32, i32, i32
  }
  func.func @transform_6(%arg0: i32, %arg1: i32, %arg2: memref<2xi32, #tpu.memory_space<smem>>, %arg3: memref<2xi32, #tpu.memory_space<smem>>) -> (i32, i32, i32) {
    %c0_i32 = arith.constant 0 : i32
    %c0_i32_0 = arith.constant 0 : i32
    %c0_i32_1 = arith.constant 0 : i32
    return %arg1, %c0_i32, %c0_i32_0 : i32, i32, i32
  }
  func.func @transform_7(%arg0: i32, %arg1: i32, %arg2: memref<2xi32, #tpu.memory_space<smem>>, %arg3: memref<2xi32, #tpu.memory_space<smem>>) -> (i32, i32, i32) {
    %c0_i32 = arith.constant 0 : i32
    %c0_i32_0 = arith.constant 0 : i32
    %c0_i32_1 = arith.constant 0 : i32
    return %arg1, %c0_i32, %c0_i32_0 : i32, i32, i32
  }
  func.func @transform_8(%arg0: i32, %arg1: i32, %arg2: memref<2xi32, #tpu.memory_space<smem>>, %arg3: memref<2xi32, #tpu.memory_space<smem>>) -> (i32, i32, i32) {
    %c0_i32 = arith.constant 0 : i32
    %c0_i32_0 = arith.constant 0 : i32
    %c0_i32_1 = arith.constant 0 : i32
    return %arg1, %c0_i32, %c0_i32_0 : i32, i32, i32
  }
  func.func @transform_9(%arg0: i32, %arg1: i32, %arg2: memref<2xi32, #tpu.memory_space<smem>>, %arg3: memref<2xi32, #tpu.memory_space<smem>>) -> (i32, i32, i32) {
    %c0_i32 = arith.constant 0 : i32
    %c0_i32_0 = arith.constant 0 : i32
    %c0_i32_1 = arith.constant 0 : i32
    return %arg1, %c0_i32, %c0_i32_0 : i32, i32, i32
  }
  func.func @transform_10(%arg0: i32, %arg1: i32, %arg2: memref<2xi32, #tpu.memory_space<smem>>, %arg3: memref<2xi32, #tpu.memory_space<smem>>) -> (i32, i32, i32) {
    %c0_i32 = arith.constant 0 : i32
    %c0_i32_0 = arith.constant 0 : i32
    %c0_i32_1 = arith.constant 0 : i32
    return %arg1, %c0_i32, %c0_i32_0 : i32, i32, i32
  }
  func.func @transform_11(%arg0: i32, %arg1: i32, %arg2: memref<2xi32, #tpu.memory_space<smem>>, %arg3: memref<2xi32, #tpu.memory_space<smem>>) -> (i32, i32, i32) {
    %c0_i32 = arith.constant 0 : i32
    %c0_i32_0 = arith.constant 0 : i32
    %c0_i32_1 = arith.constant 0 : i32
    return %arg1, %c0_i32, %c0_i32_0 : i32, i32, i32
  }
  func.func @transform_12(%arg0: i32, %arg1: i32, %arg2: memref<2xi32, #tpu.memory_space<smem>>, %arg3: memref<2xi32, #tpu.memory_space<smem>>) -> (i32, i32, i32) {
    %c0_i32 = arith.constant 0 : i32
    %c0_i32_0 = arith.constant 0 : i32
    %c0_i32_1 = arith.constant 0 : i32
    return %arg1, %c0_i32, %c0_i32_0 : i32, i32, i32
  }
  func.func @transform_13(%arg0: i32, %arg1: i32, %arg2: memref<2xi32, #tpu.memory_space<smem>>, %arg3: memref<2xi32, #tpu.memory_space<smem>>) -> (i32, i32, i32) {
    %c0_i32 = arith.constant 0 : i32
    %c0_i32_0 = arith.constant 0 : i32
    %c0_i32_1 = arith.constant 0 : i32
    return %arg1, %c0_i32, %c0_i32_0 : i32, i32, i32
  }
  func.func @transform_14(%arg0: i32, %arg1: i32, %arg2: memref<2xi32, #tpu.memory_space<smem>>, %arg3: memref<2xi32, #tpu.memory_space<smem>>) -> (i32, i32, i32) {
    %c0_i32 = arith.constant 0 : i32
    %c0_i32_0 = arith.constant 0 : i32
    %c0_i32_1 = arith.constant 0 : i32
    return %arg1, %c0_i32, %c0_i32_0 : i32, i32, i32
  }
  func.func @transform_15(%arg0: i32, %arg1: i32, %arg2: memref<2xi32, #tpu.memory_space<smem>>, %arg3: memref<2xi32, #tpu.memory_space<smem>>) -> (i32, i32, i32) {
    %c0_i32 = arith.constant 0 : i32
    %c0_i32_0 = arith.constant 0 : i32
    %c0_i32_1 = arith.constant 0 : i32
    return %arg1, %c0_i32, %c0_i32_0 : i32, i32, i32
  }
  func.func @transform_16(%arg0: i32, %arg1: i32, %arg2: memref<2xi32, #tpu.memory_space<smem>>, %arg3: memref<2xi32, #tpu.memory_space<smem>>) -> (i32, i32, i32) {
    %c0_i32 = arith.constant 0 : i32
    %c0_i32_0 = arith.constant 0 : i32
    %c0_i32_1 = arith.constant 0 : i32
    return %arg1, %c0_i32, %c0_i32_0 : i32, i32, i32
  }
  func.func @transform_17(%arg0: i32, %arg1: i32, %arg2: memref<2xi32, #tpu.memory_space<smem>>, %arg3: memref<2xi32, #tpu.memory_space<smem>>) -> (i32, i32, i32) {
    %c0_i32 = arith.constant 0 : i32
    %c0_i32_0 = arith.constant 0 : i32
    %c0_i32_1 = arith.constant 0 : i32
    return %arg0, %c0_i32, %c0_i32_0 : i32, i32, i32
  }
}

</mosaic_0001>

<bundles_post_ra>
// kernel: tpu_custom_call.1
= control target key start
LH: loop header
LB: loop body
LE: loop exit
PB: predicated region body
PF: predicated region fallthrough
CT: control target
= control target key end

     0   :  { %s2067_s23 = smov [#allocation4]   ;;  %s2514_s0 = inlined_call_operand.vmem [shape: s32[2], index: 0, kind: input, shape index: {}]   ;;  %s2515_s2 = inlined_call_operand.vmem [shape: f32[2,12,16], index: 2, kind: input, shape index: {}]   ;;  %s2516_s3 = inlined_call_operand.vmem [shape: f32[2,1,16], index: 3, kind: input, shape index: {}]   ;;  %s2517_s4 = inlined_call_operand.vmem [shape: f32[2,1,16], index: 4, kind: input, shape index: {}]   ;;  %s2518_s5 = inlined_call_operand.vmem [shape: bf16[2,16,32], index: 5, kind: input, shape index: {}]   ;;  %s2519_s6 = inlined_call_operand.vmem [shape: f32[2,1,32], index: 6, kind: input, shape index: {}]   ;;  %s2520_s7 = inlined_call_operand.vmem [shape: bf16[2,16,32], index: 7, kind: input, shape index: {}]   ;;  %s2521_s8 = inlined_call_operand.vmem [shape: f32[2,1,32], index: 8, kind: input, shape index: {}]   ;;  %s2522_s9 = inlined_call_operand.vmem [shape: bf16[2,16,32], index: 9, kind: input, shape index: {}]   ;;  %s2523_s10 = inlined_call_operand.vmem [shape: f32[2,1,32], index: 10, kind: input, shape index: {}]   ;;  %s2524_s11 = inlined_call_operand.vmem [shape: bf16[2,32,16], index: 11, kind: input, shape index: {}]   ;;  %s2525_s12 = inlined_call_operand.vmem [shape: f32[2,1,16], index: 12, kind: input, shape index: {}]   ;;  %s2526_s13 = inlined_call_operand.vmem [shape: f32[2,1,16], index: 13, kind: input, shape index: {}]   ;;  %s2527_s14 = inlined_call_operand.vmem [shape: f32[2,1,16], index: 14, kind: input, shape index: {}]   ;;  %s2528_s15 = inlined_call_operand.vmem [shape: bf16[2,48,32], index: 15, kind: input, shape index: {}]   ;;  %s2529_s16 = inlined_call_operand.vmem [shape: f32[2,1,32], index: 16, kind: input, shape index: {}]   ;;  %s2530_s17 = inlined_call_operand.vmem [shape: bf16[2,96,16], index: 17, kind: input, shape index: {}]   ;;  %s2531_s18 = inlined_call_operand.vmem [shape: f32[2,1,16], index: 18, kind: input, shape index: {}]   ;;  %s2532_s19 = inlined_call_operand.vmem [shape: f32[2,12,16], index: 19, kind: output, shape index: {}]   ;;  %s2533_s1 = inlined_call_operand.vmem [shape: s32[2], index: 1, kind: input, shape index: {}]  }
   0x1   :  { %2540 = sst [smem:[#allocation13_spill]] %s2514_s0  ;;  %s30_s22 = sshll.u32 %s2533_s1, 4  ;;  %s31_s22 = int_to_ptr.vmem [resolvable:$true] %s30_s22 }
   0x2   :  { %2541 = sst [smem:[#allocation14_spill]] %s2515_s2 }
   0x3   :  { %2542 = sst [smem:[#allocation15_spill]] %s2516_s3  ;;  %s2066_s3 = smov [#allocation3]  }
   0x4   :  { %2543 = sst [smem:[#allocation16_spill]] %s2517_s4 }
   0x5   :  { %2544 = sst [smem:[#allocation17_spill]] %s2518_s5 }
   0x6   :  { %2545 = sst [smem:[#allocation18_spill]] %s2523_s10 }
   0x7   :  { %2546 = sst [smem:[#allocation19_spill]] %s2524_s11 }
   0x8   :  { %2547 = sst [smem:[#allocation20_spill]] %s2526_s13 }
   0x9   :  { %2548 = sst [smem:[#allocation21_spill]] %s2527_s14 }
   0xa   :  { %2549 = sst [smem:[#allocation22_spill]] %s2530_s17 }
   0xb   :  { %2550 = sst [smem:[#allocation23_spill]] %s2531_s18 }
   0xc   :  { %2551 = sst [smem:[#allocation24_spill]] %s2532_s19 }
   0xd   :  { %s2552_s20 = sld [smem:[#allocation13_spill]] }
  0x13   :  { %s25_s14 = sshll.u32 %s2552_s20, 4  ;;  %s26_s14 = int_to_ptr.vmem [resolvable:$true] %s25_s14 }
  0x14   :  { %28 = dma.vmem_to_smem %s26_s14, 16, %s2066_s3, [#allocation2] }
  0x15   :  { %33 = dma.vmem_to_smem %s31_s22, 16, %s2067_s23, [#allocation2] }
  0x16   :  { %2044 = dma.done.wait [#allocation2], 32 }
  0x17   :  { %2045 = vsyncadd [#allocation2], 4294967264 }
  0x18   :  { %36 = sfence }
  0x19   :  { %s2180_s24 = smov 0   ;;  %s2182_s25 = smov 0  }
  0x1a   :  { %s2184_s4 = smov 0   ;;  %s2186_s26 = smov 0  }
  0x1b   :  { %s2188_s27 = smov 0  }
  0x1c LB: > { %2553 = sst [smem:[#allocation6_spill]] %s2048_s24  ;;  %s51_s1 = sadd.s32 1, %s2056_s4  ;;  %s2064_s27 = sphi %s2188_s27, %s42_s27   ;;  %s2060_s26 = sphi %s2186_s26, %s2595_s26   ;;  %s2056_s4 = sphi %s2184_s4, %s2594_s4   ;;  %s2052_s25 = sphi %s2182_s25, %s2593_s25   ;;  %s2048_s24 = sphi %s2180_s24, %s2592_s24  }
  0x1d   : > { %2554 = sst [smem:[#allocation7_spill]] %s2052_s25  ;;  %s54_s14 = sadd.s32 1, %s2060_s26 }
  0x1e   : > { %2555 = sst [smem:[#allocation8_spill]] %s2056_s4  ;;  %p52_p0 = scmp.ge.s32.totalorder %s51_s1, 2 }
  0x1f   : > { %2556 = sst [smem:[#allocation9_spill]] %s2060_s26  ;;  %p1782_p1 = scmp.ge.s32.totalorder %s2064_s27, 1 }
  0x20   : > { %2557 = sst [smem:[#allocation10_spill]] %s2064_s27  ;;  %p654_p2 = scmp.lt.s32.totalorder %s2064_s27, 5 }
  0x21   : > { %s2597_s1 = smov (%p52_p0, %s51_s1), 0  ;;  %s2599_s14 = smov (!%p52_p0, %s54_s14), %s2060_s26 }
  0x22   : > { %2558 = sst [smem:[#allocation11_spill]] %s2597_s1  ;;  %p655_p3 = pnand %p1782_p1, %p654_p2 }
  0x23   : > { %p56_p4 = scmp.ge.s32.totalorder %s2599_s14, 2  ;;  %p766_p5 = scmp.lt.s32.totalorder (!%p655_p3), %s2052_s25, 1 }
  0x24   : > { %658 = sbr.rel (%p655_p3) target bundleno = 2209 (0x8a1), region = 88  ;;  %p771_p6 = scmp.lt.s32.totalorder (!%p655_p3), %s2048_s24, 1 }
  0x25   : > { %s2601_s14 = smov (%p56_p4, %s2599_s14), 0  ;;  %s2560_s21 = sld [smem:[#allocation14_spill]] (!%p655_p3) }
  0x26   : > { %2559 = sst [smem:[#allocation12_spill]] %s2601_s14 }
  0x27   : > { %s2565_s11 = sld [smem:[#allocation19_spill]] (!%p655_p3) }
  0x28   : > { %s2569_s13 = sld [smem:[#allocation22_spill]] (!%p655_p3) }
  0x29   : > { %s767_s28 = scalar_select %p766_p5, %s2052_s25, 1 }
  0x2a   : > { %s2218_s29 = scalar_select %p771_p6, %s2048_s24, 1 }
  0x2b   : > { %s1869_s0 = sshll.u32 %s767_s28, 4  ;;  %s2570_s26 = sld [smem:[#allocation24_spill]] }
  0x2c   : > { %s770_s2 = scalar_lea.vmem %s2560_s21, %s1869_s0  ;;  %s2232_s25 = sshll.u32 %s2218_s29, 3 }
  0x2d   : > { %s1873_s5 = sshll.u32 %s2218_s29, 4  ;;  %s1889_s17 = smul.u32 24, %s2218_s29 }
  0x2e   : > { %s2266_s23 = scalar_lea.vmem %s2565_s11, %s1873_s5  ;;  %s822_s10 = scalar_lea.vmem %s2529_s16, %s2218_s29 }
  0x2f   : > { %s1890_s18 = smul.u32 48, %s2218_s29  ;;  %s2285_s22 = scalar_lea.vmem %s2528_s15, %s1889_s17 }
  0x30   : > { %s2568_s11 = sld [smem:[#allocation23_spill]] }
  0x31   : > { %s2294_s19 = scalar_lea.vmem %s2569_s13, %s1890_s18  ;;  %s2299_s30 = scalar_lea.vmem %s2570_s26, %s1869_s0 }
  0x32   : > { %s2571_s28 = sld [smem:[#allocation6_spill]] }
  0x36   : > { %s830_s1 = scalar_lea.vmem %s2568_s11, %s2218_s29 }
  0x38   : > { %p1797_p7 = scmp.ne.s32.totalorder %s2571_s28, 0 }
  0x3a   : > { %840 = sbr.rel (%p1797_p7) target bundleno = 66 (0x42), region = 92 }
  0x3f   : > { %v841_v0 = vld [vmem:[%s770_s2] sm:$0xff]  ;;  %vm843_vm0 = vcmask 130048   ;;  %v842_v1 = vld [vmem:[%s770_s2 + $0x8] sm:$0xf]  ;;  %vm845_vm1 = vcmask 125952  }
  0x40   : > { %844 = vst.msk [vmem:[%s2299_s30] sm:$0xff] %vm843_vm0, %v841_v0 }
  0x41   : > { %846 = vst.msk [vmem:[%s2299_s30 + $0x8] sm:$0xf] %vm845_vm1, %v842_v1 }
  0x42 PF: > { %vm871_vm2 = vcmask 130048   ;;  %vm875_vm3 = vcmask 125952   ;;  %v2068_v6 = vmov 16.0   ;;  %s2572_s27 = sld [smem:[#allocation17_spill]]  ;;  %s2574_s21 = scalar_lea.vmem %s2520_s7, %s2232_s25  ;;  %vm1132_vm11 = vcmask 1045504  }
  0x43   : > { %1974 = vrcp.f32 %v2068_v6  ;;  %v1876_v24 = vld [vmem:[%s2574_s21] sm:$0xff]  ;;  %s2575_s20 = scalar_lea.vmem %s2522_s9, %s2232_s25  ;;  %s2576_s3 = sld [smem:[#allocation15_spill]]  ;;  %vm1057_vm0 = vcmask 97280   ;;  %vm1061_vm1 = vcmask 93184  }
  0x44   : > { %983 = vmatpush.bf16.msra.mxu2 %v1876_v24  ;;  %v1877_v28 = vld [vmem:[%s2575_s20] sm:$0xff]  ;;  %s2578_s28 = sld [smem:[#allocation16_spill]]  ;;  %s2581_s21 = scalar_lea.vmem %s2519_s6, %s2218_s29 }
  0x45   : > { %v1966_v61 = vld [vmem:[%s2581_s21] ss:$0 sm:$0xff]  ;;  %s2582_s20 = sld [smem:[#allocation18_spill]]  ;;  %s2069_s5 = smov 112  }
  0x46   : > { %s2071_s14 = smov 16   ;;  %s2585_s13 = scalar_lea.vmem %s2525_s12, %s2218_s29 }
  0x47   : > { %v2305_v2 = vld [vmem:[%s2299_s30] sm:$0xff]  ;;  %s2588_s17 = sld [smem:[#allocation21_spill]] }
  0x48   : > { %v872_v3 = vsel %vm871_vm2, %v2305_v2, 0.0  ;;  %v2310_v4 = vld [vmem:[%s2299_s30 + $0x8] sm:$0xf]  ;;  %s2573_s0 = scalar_lea.vmem %s2572_s27, %s2232_s25  ;;  %1009 = vmatpush.bf16.msrb.mxu2 %v1877_v28 }
  0x49   : > { %873 = vadd.xlane.f32.xlu0 %v872_v3  ;;  %v876_v5 = vsel %vm875_vm3, %v2310_v4, 0.0  ;;  %v1975_v7 = vpop.eup %1974  ;;  %v1875_v23 = vld [vmem:[%s2573_s0] sm:$0xff]  ;;  %s2577_s4 = scalar_lea.vmem %s2576_s3, %s2218_s29  ;;  %s2580_s0 = scalar_lea.vmem %s2521_s8, %s2218_s29 }
  0x4a   : > { %v880_v8 = vmul.f32 16.0, %v1975_v7  ;;  %vm884_vm4 = vweird.f32 %v1975_v7  ;;  %957 = vmatpush.bf16.msra.mxu0 %v1875_v23  ;;  %v1964_v45 = vld [vmem:[%s2577_s4] ss:$0 sm:$0xff]  ;;  %s2579_s11 = scalar_lea.vmem %s2578_s28, %s2218_s29  ;;  %s2584_s3 = sld [smem:[#allocation7_spill]] }
  0x4b   : > { %v1965_v50 = vld [vmem:[%s2579_s11] ss:$0 sm:$0xff]  ;;  %s2583_s25 = scalar_lea.vmem %s2582_s20, %s2218_s29  ;;  %s2072_s20 = smov 32  }
  0x4c   : > { %v881_v9 = vsub.f32 1.0, %v880_v8  ;;  %v1967_v57 = vld [vmem:[%s2580_s0] ss:$0 sm:$0xff]  ;;  %s2586_s0 = sld [smem:[#allocation20_spill]] }
  0x4d   : > { %s2589_s18 = scalar_lea.vmem %s2588_s17, %s2218_s29 }
  0x4e   : > { %v882_v10 = vmul.f32 %v1975_v7, %v881_v9 }
  0x50   : > { %v883_v11 = vadd.f32 %v1975_v7, %v882_v10  ;;  %s859_s4 = sld [smem:[#allocation3 + %s2584_s3]] }
  0x51   : > { %877 = vadd.xlane.f32.xlu0 %v876_v5  ;;  %s854_s24 = sld [smem:[#allocation4 + %s2584_s3]] }
  0x52   : > { %v2314_v12 = vsel %vm884_vm4, %v1975_v7, %v883_v11  ;;  %v1968_v11 = vld [vmem:[%s2583_s25] ss:$0 sm:$0xff]  ;;  %s2587_s2 = scalar_lea.vmem %s2586_s0, %s2218_s29 }
  0xbc   : > { %v874_v13 = vpop.xlane.xlu0 %873 }
  0xbd   : > { %v886_v14 = vmul.f32 %v2314_v12, %v874_v13 }
  0xbf   : > { %v888_v15 = vsub.f32 %v2305_v2, %v886_v14 }
  0xc1   : > { %v890_v16 = vmul.f32 %v888_v15, %v888_v15 }
  0xc3   : > { %v892_v17 = vsel %vm871_vm2, %v890_v16, 0.0 }
  0xc4   : > { %893 = vadd.xlane.f32.xlu1 %v892_v17  ;;  %v878_v18 = vpop.xlane.xlu0 %877 }
  0xc5   : > { %v887_v19 = vmul.f32 %v2314_v12, %v878_v18 }
  0xc7   : > { %v889_v20 = vsub.f32 %v2310_v4, %v887_v19 }
  0xc9   : > { %v891_v21 = vmul.f32 %v889_v20, %v889_v20 }
  0xcb   : > { %v895_v22 = vsel %vm875_vm3, %v891_v21, 0.0 }
  0xcc   : > { %896 = vadd.xlane.f32.xlu1 %v895_v22 }
 0x137   : > { %v894_v25 = vpop.xlane.xlu1 %893 }
 0x138   : > { %v898_v26 = vmul.f32 %v894_v25, %v2314_v12 }
 0x13a   : > { %v900_v27 = vadd.f32 1e-05, %v898_v26 }
 0x13c   : > { %1976 = vrsqrt.f32 %v900_v27  ;;  %vm908_vm6 = vweird.f32 %v900_v27 }
 0x13f   : > { %v897_v29 = vpop.xlane.xlu1 %896 }
 0x140   : > { %v899_v30 = vmul.f32 %v897_v29, %v2314_v12  ;;  %v849_v29 = vlaneseq }
 0x142   : > { %v1977_v31 = vpop.eup %1976  ;;  %v901_v32 = vadd.f32 1e-05, %v899_v30  ;;  %v852_v30 = vshrl.u32 %v849_v29, 7 }
 0x143   : > { %v903_v33 = vmul.f32 %v1977_v31, %v900_v27  ;;  %vm909_vm5 = vweird.f32 %v1977_v31 }
 0x144   : > { %1978 = vrsqrt.f32 %v901_v32  ;;  %vm910_vm7 = vmor %vm908_vm6, %vm909_vm5  ;;  %vm918_vm9 = vweird.f32 %v901_v32 }
 0x145   : > { %v904_v34 = vmul.f32 %v1977_v31, %v903_v33  ;;  %v2070_v33 = vmov 0.0  }
 0x147   : > { %v905_v35 = vmul.f32 0.5, %v904_v34 }
 0x149   : > { %v906_v36 = vsub.f32 1.5, %v905_v35 }
 0x14a   : > { %v1979_v37 = vpop.eup %1978 }
 0x14b   : > { %v907_v38 = vmul.f32 %v1977_v31, %v906_v36  ;;  %v913_v39 = vmul.f32 %v1979_v37, %v901_v32  ;;  %vm919_vm8 = vweird.f32 %v1979_v37  ;;  %v853_v32 = vadd.s32 8, %v852_v30 }
 0x14c   : > { %vm920_vm10 = vmor %vm918_vm9, %vm919_vm8  ;;  %v850_v36 = vand.u32 127, %v849_v29 }
 0x14d   : > { %v914_v40 = vmul.f32 %v1979_v37, %v913_v39  ;;  %v911_v41 = vsel %vm910_vm7, %v1977_v31, %v907_v38  ;;  %v860_v31 = vstv %s859_s4 }
 0x14e   : > { %v922_v44 = vmul.f32 %v911_v41, %v888_v15  ;;  %vm861_vm12 = vcmp.ge.s32.totalorder %v852_v30, %v860_v31  ;;  %vm862_vm13 = vcmp.ge.s32.totalorder %v853_v32, %v860_v31 }
 0x14f   : > { %v915_v42 = vmul.f32 0.5, %v914_v40  ;;  %v2378_v34 = vsel %vm861_vm12, 1.0, %v2070_v33  ;;  %v2380_v35 = vsel %vm862_vm13, 1.0, %v2070_v33 }
 0x150   : > { %v927_v49 = vmul.f32 %v1964_v45, %v922_v44  ;;  %vm1107_vm9 = vcmp.gt.f32.partialorder %v2378_v34, 0.5 }
 0x151   : > { %v916_v43 = vsub.f32 1.5, %v915_v42 }
 0x152   : > { %v932_v52 = vadd.f32 %v1965_v50, %v927_v49 }
 0x153   : > { %v917_v46 = vmul.f32 %v1979_v37, %v916_v43 }
 0x155   : > { %v921_v47 = vsel %vm920_vm10, %v1979_v37, %v917_v46  ;;  %v855_v37 = vstv %s854_s24 }
 0x156   : > { %v923_v48 = vmul.f32 %v921_v47, %v889_v20  ;;  %vm856_vm14 = vcmp.ge.s32.totalorder %v850_v36, %v855_v37 }
 0x157   : > { %v1798_v38 = vsel %vm856_vm14, 1.0, %v2070_v33  ;;  %vm1108_vm14 = vcmp.gt.f32.partialorder %v2380_v35, 0.5 }
 0x158   : > { %v928_v51 = vmul.f32 %v1964_v45, %v923_v48  ;;  %vm1052_vm15 = vcmp.gt.f32.partialorder %v1798_v38, 0.5 }
 0x15a   : > { %v933_v53 = vadd.f32 %v1965_v50, %v928_v51 }
 0x15c   : > { %v936_v54 = vpack.c.bf16 %v933_v53, %v932_v52 }
 0x15e   : > { %1805 = vmatmul.msk.bf16.vlgmr.msra.gmra.mxu0 %vm871_vm2, %v936_v54  ;;  %1810 = vmatmul.msk.bf16.vlgmr.msra.gmra.mxu2 %vm871_vm2, %v936_v54 }
 0x16e   : > { %1815 = vmatmul.msk.bf16.vlgmr.msrb.gmra.mxu2 %vm871_vm2, %v936_v54 }
 0x1db   : > { %v959_v55 = vpop.f32.mrf.mxu0 }
 0x1dc   : > { %v960_v3 = vadd.f32 %v1966_v61, %v959_v55 }
 0x1de   : > { %v1016_v10 = vpack.c.bf16 %v960_v3, %v960_v3 }
 0x1e0   : > { %v1022_v15 = vunpack.c.l.b16 %v1016_v10 }
 0x1e1   : > { %v985_v56 = vpop.f32.mrf.mxu2 }
 0x1e2   : > { %v986_v58 = vadd.f32 %v1967_v57, %v985_v56 }
 0x1e3   : > { %v961_v59 = vpop.f32.mrf.mxu0 }
 0x1e4   : > { %v1018_v62 = vpack.c.bf16 %v986_v58, %v986_v58  ;;  %v962_v0 = vadd.f32 %v1966_v61, %v961_v59 }
 0x1e6   : > { %v1027_v5 = vunpack.c.l.b16 %v1018_v62  ;;  %v1017_v7 = vpack.c.bf16 %v962_v0, %v962_v0 }
 0x1e8   : > { %v1023_v14 = vunpack.c.l.b16 %v1017_v7 }
 0x1e9   : > { %v987_v60 = vpop.f32.mrf.mxu2 }
 0x1ea   : > { %v988_v63 = vadd.f32 %v1967_v57, %v987_v60  ;;  %v1024_v17 = vpack.c.b16 %v1023_v14, %v1022_v15 }
 0x1ec   : > { %v1019_v1 = vpack.c.bf16 %v988_v63, %v988_v63 }
 0x1ee   : > { %v1028_v6 = vunpack.c.l.b16 %v1019_v1 }
 0x1f0   : > { %v1029_v8 = vpack.c.b16 %v1028_v6, %v1027_v5 }
 0x1f1   : > { %v1011_v9 = vpop.f32.mrf.mxu2 }
 0x1f2   : > { %1152 = vrot.lane.b32.xlu2 %v1029_v8, %s2069_s5  ;;  %v1034_v13 = vsel %vm871_vm2, %v1029_v8, 0  ;;  %v1012_v16 = vadd.f32 %v1968_v11, %v1011_v9 }
 0x1f3   : > { %1043 = vmatpush.bf16.xpose.msra.mxu3 %v1034_v13 }
 0x1f4   : > { %v1117_v19 = vpack.c.bf16 %v1012_v16, %v1012_v16 }
 0x1f6   : > { %v1126_v22 = vunpack.c.l.b16 %v1117_v19 }
 0x1f9   : > { %v1013_v18 = vpop.f32.mrf.mxu2 }
 0x1fa   : > { %v1014_v20 = vadd.f32 %v1968_v11, %v1013_v18  ;;  %1150 = vrot.lane.b32.xlu2 %v1024_v17, %s2069_s5  ;;  %1816 = vmatmul.msk.bf16.vlgmr.msra.gmra.mxu3 %vm871_vm2, %v1024_v17 }
 0x1fc   : > { %v1118_v21 = vpack.c.bf16 %v1014_v20, %v1014_v20 }
 0x1fe   : > { %v1127_v23 = vunpack.c.l.b16 %v1118_v21 }
 0x200   : > { %v2371_v24 = vpack.c.b16 %v1127_v23, %v1126_v22 }
 0x202   : > { %v1134_v25 = vsel %vm1132_vm11, %v2371_v24, 0 }
 0x203   : > { %1143 = vmatpush.bf16.msrb.mxu0 %v1134_v25 }
 0x24c   : > { %v1153_v26 = vpop.permute.xlu2 %1152 }
 0x24d   : > { %v1158_v27 = vsel %vm871_vm2, %v1153_v26, 0 }
 0x24e   : > { %1167 = vmatpush.bf16.xpose.msra.mxu1 %v1158_v27 }
 0x254   : > { %v1151_v28 = vpop.permute.xlu2 %1150 }
 0x255   : > { %1818 = vmatmul.msk.bf16.vlgmr.msra.gmra.mxu1 %vm871_vm2, %v1151_v28 }
 0x27d   : > { %v1045_v39 = vpop.f32.mrf.mxu3 }
 0x27e   : > { %v1050_v40 = vmul.f32 0.25, %v1045_v39 }
 0x280   : > { %v1055_v41 = vsel %vm1052_vm15, -1e+30, %v1050_v40 }
 0x281   : > { %v1058_v42 = vsel %vm1057_vm0, %v1055_v41, -inf }
 0x282   : > { %1059 = vmax.xlane.f32.xlu2 %v1058_v42 }
 0x285   : > { %v1047_v45 = vpop.f32.mrf.mxu3 }
 0x286   : > { %v1051_v48 = vmul.f32 0.25, %v1047_v45 }
 0x288   : > { %v1056_v51 = vsel %vm1052_vm15, -1e+30, %v1051_v48 }
 0x289   : > { %v1062_v54 = vsel %vm1061_vm1, %v1056_v51, -inf }
 0x2d2   : > { %v1169_v43 = vpop.f32.mrf.mxu1 }
 0x2d3   : > { %v1174_v44 = vmul.f32 0.25, %v1169_v43 }
 0x2d5   : > { %v1176_v46 = vsel %vm1052_vm15, -1e+30, %v1174_v44 }
 0x2d6   : > { %v1178_v47 = vsel %vm1057_vm0, %v1176_v46, -inf }
 0x2d7   : > { %1179 = vmax.xlane.f32.xlu0 %v1178_v47 }
 0x2da   : > { %v1171_v49 = vpop.f32.mrf.mxu1 }
 0x2db   : > { %v1175_v50 = vmul.f32 0.25, %v1171_v49 }
 0x2dd   : > { %v1177_v52 = vsel %vm1052_vm15, -1e+30, %v1175_v50 }
 0x2de   : > { %v1181_v53 = vsel %vm1061_vm1, %v1177_v52, -inf }
 0x2df   : > { %1182 = vmax.xlane.f32.xlu1 %v1181_v53  ;;  %1063 = vmax.xlane.f32.xlu0 %v1062_v54 }
 0x2f5   : > { %v1060_v58 = vpop.xlane.xlu2 %1059 }
 0x2f6   : > { %v1065_v62 = vsub.f32 %v1055_v41, %v1060_v58 }
 0x2f8   : > { %v1067_v1 = vmul.f32 1.442695, %v1065_v62 }
 0x34a   : > { %v1180_v55 = vpop.xlane.xlu0 %1179 }
 0x34b   : > { %v1184_v56 = vsub.f32 %v1176_v46, %v1180_v55 }
 0x34d   : > { %v1186_v57 = vmul.f32 1.442695, %v1184_v56 }
 0x34f   : > { %1980 = vpow2.f32 %v1186_v57 }
 0x352   : > { %v1183_v59 = vpop.xlane.xlu1 %1182  ;;  %v1064_v3 = vpop.xlane.xlu0 %1063 }
 0x353   : > { %v1185_v60 = vsub.f32 %v1177_v52, %v1183_v59  ;;  %v1066_v6 = vsub.f32 %v1056_v51, %v1064_v3 }
 0x355   : > { %v1981_v61 = vpop.eup %1980  ;;  %v1188_v63 = vmul.f32 1.442695, %v1185_v60  ;;  %v1069_v8 = vmul.f32 1.442695, %v1066_v6 }
 0x356   : > { %v1190_v0 = vsel %vm1057_vm0, %v1981_v61, 0.0 }
 0x357   : > { %1982 = vpow2.f32 %v1188_v63  ;;  %1191 = vadd.xlane.f32.xlu1 %v1190_v0 }
 0x358   : > { %1984 = vpow2.f32 %v1067_v1 }
 0x359   : > { %1986 = vpow2.f32 %v1069_v8 }
 0x35d   : > { %v1983_v5 = vpop.eup %1982 }
 0x35e   : > { %v1193_v7 = vsel %vm1061_vm1, %v1983_v5, 0.0  ;;  %v2393_v9 = vpop.eup %1984 }
 0x35f   : > { %1194 = vadd.xlane.f32.xlu0 %v1193_v7  ;;  %v1071_v10 = vsel %vm1057_vm0, %v2393_v9, 0.0  ;;  %v2397_v11 = vpop.eup %1986 }
 0x360   : > { %v1074_v13 = vsel %vm1061_vm1, %v2397_v11, 0.0 }
 0x367   : > { %1072 = vadd.xlane.f32.xlu0 %v1071_v10 }
 0x36f   : > { %1075 = vadd.xlane.f32.xlu0 %v1074_v13 }
 0x370   : > { %1235 = vrot.lane.b32.xlu1 %v2371_v24, %s2069_s5 }
 0x3ca   : > { %v1192_v14 = vpop.xlane.xlu1 %1191 }
 0x3cb   : > { %1988 = vrcp.f32 %v1192_v14  ;;  %v1207_v19 = vand.u32 2147483648, %v1192_v14  ;;  %v1205_v21 = vand.u32 2147483647, %v1192_v14  ;;  %vm1201_vm5 = vweird.f32 %v1192_v14 }
 0x3cd   : > { %v1208_v25 = vor.u32 1.1754944e-38, %v1207_v19  ;;  %vm1206_vm7 = vcmp.eq.f32.partialorder %v1205_v21, 8.507059e+37 }
 0x3d1   : > { %v1989_v15 = vpop.eup %1988 }
 0x3d2   : > { %v1197_v16 = vmul.f32 %v1989_v15, %v1192_v14  ;;  %v1195_v17 = vpop.xlane.xlu0 %1194  ;;  %vm1202_vm4 = vweird.f32 %v1989_v15 }
 0x3d3   : > { %1990 = vrcp.f32 %v1195_v17  ;;  %vm1203_vm6 = vmor %vm1201_vm5, %vm1202_vm4  ;;  %v1222_v30 = vand.u32 2147483648, %v1195_v17  ;;  %v1220_v33 = vand.u32 2147483647, %v1195_v17  ;;  %vm1216_vm10 = vweird.f32 %v1195_v17 }
 0x3d4   : > { %v1198_v18 = vsub.f32 1.0, %v1197_v16 }
 0x3d5   : > { %v1223_v38 = vor.u32 1.1754944e-38, %v1222_v30  ;;  %vm1221_vm13 = vcmp.eq.f32.partialorder %v1220_v33, 8.507059e+37  ;;  %v1969_v30 = vld [vmem:[%s2585_s13] ss:$0 sm:$0xff] }
 0x3d6   : > { %v1199_v20 = vmul.f32 %v1989_v15, %v1198_v18 }
 0x3d8   : > { %v1200_v22 = vadd.f32 %v1989_v15, %v1199_v20  ;;  %v1879_v20 = vld [vmem:[%s2266_s23 + $0x8] sm:$0xff] }
 0x3d9   : > { %v1991_v23 = vpop.eup %1990  ;;  %1298 = vmatpush.bf16.msrb.mxu3 %v1879_v20 }
 0x3da   : > { %v1204_v26 = vsel %vm1203_vm6, %v1989_v15, %v1200_v22  ;;  %v1212_v27 = vmul.f32 %v1991_v23, %v1195_v17  ;;  %v1073_v24 = vpop.xlane.xlu0 %1072  ;;  %vm1217_vm8 = vweird.f32 %v1991_v23 }
 0x3db   : > { %v1209_v28 = vsel %vm1206_vm7, %v1208_v25, %v1204_v26  ;;  %1992 = vrcp.f32 %v1073_v24  ;;  %vm1218_vm12 = vmor %vm1216_vm10, %vm1217_vm8  ;;  %v1088_v48 = vand.u32 2147483648, %v1073_v24  ;;  %v1086_v52 = vand.u32 2147483647, %v1073_v24 }
 0x3dc   : > { %v1213_v29 = vsub.f32 1.0, %v1212_v27  ;;  %v1210_v31 = vmul.f32 %v1981_v61, %v1209_v28  ;;  %vm1082_vm1 = vweird.f32 %v1073_v24 }
 0x3dd   : > { %v1089_v56 = vor.u32 1.1754944e-38, %v1088_v48 }
 0x3de   : > { %v1214_v32 = vmul.f32 %v1991_v23, %v1213_v29  ;;  %v1226_v39 = vsel %vm1107_vm9, 0.0, %v1210_v31 }
 0x3df   : > { %v1228_v49 = vpack.c.bf16 %v1226_v39, %v1226_v39 }
 0x3e0   : > { %v1215_v36 = vadd.f32 %v1991_v23, %v1214_v32 }
 0x3e1   : > { %v1993_v37 = vpop.eup %1992  ;;  %v1232_v57 = vunpack.c.l.b16 %v1228_v49 }
 0x3e2   : > { %v1219_v40 = vsel %vm1218_vm12, %v1991_v23, %v1215_v36  ;;  %v1078_v41 = vmul.f32 %v1993_v37, %v1073_v24  ;;  %v1236_v42 = vpop.permute.xlu1 %1235  ;;  %v1076_v43 = vpop.xlane.xlu0 %1075  ;;  %vm1083_vm15 = vweird.f32 %v1993_v37 }
 0x3e3   : > { %v1224_v44 = vsel %vm1221_vm13, %v1223_v38, %v1219_v40  ;;  %v1241_v45 = vsel %vm1132_vm11, %v1236_v42, 0  ;;  %1994 = vrcp.f32 %v1076_v43  ;;  %vm1084_vm4 = vmor %vm1082_vm1, %vm1083_vm15  ;;  %vm1087_vm11 = vcmp.eq.f32.partialorder %v1086_v52, 8.507059e+37 }
 0x3e4   : > { %v1225_v46 = vmul.f32 %v1983_v5, %v1224_v44  ;;  %v1079_v47 = vsub.f32 1.0, %v1078_v41  ;;  %1250 = vmatpush.bf16.msra.mxu2 %v1241_v45  ;;  %v1103_v0 = vand.u32 2147483648, %v1076_v43  ;;  %v1101_v3 = vand.u32 2147483647, %v1076_v43 }
 0x3e5   : > { %vm1097_vm6 = vweird.f32 %v1076_v43  ;;  %vm1371_vm1 = vcmask 1046528  }
 0x3e6   : > { %v1227_v50 = vsel %vm1108_vm14, 0.0, %v1225_v46  ;;  %v1080_v51 = vmul.f32 %v1993_v37, %v1079_v47  ;;  %v1104_v7 = vor.u32 1.1754944e-38, %v1103_v0  ;;  %vm1102_vm8 = vcmp.eq.f32.partialorder %v1101_v3, 8.507059e+37 }
 0x3e7   : > { %v1229_v53 = vpack.c.bf16 %v1227_v50, %v1227_v50 }
 0x3e8   : > { %v1081_v54 = vadd.f32 %v1993_v37, %v1080_v51 }
 0x3e9   : > { %v1995_v55 = vpop.eup %1994  ;;  %v1233_v58 = vunpack.c.l.b16 %v1229_v53 }
 0x3ea   : > { %v1085_v59 = vsel %vm1084_vm4, %v1993_v37, %v1081_v54  ;;  %v1093_v60 = vmul.f32 %v1995_v55, %v1076_v43  ;;  %vm1098_vm5 = vweird.f32 %v1995_v55  ;;  %vm1376_vm4 = vcmask 1042432  }
 0x3eb   : > { %v1090_v61 = vsel %vm1087_vm11, %v1089_v56, %v1085_v59  ;;  %v1234_v62 = vpack.c.b16 %v1233_v58, %v1232_v57  ;;  %vm1099_vm7 = vmor %vm1097_vm6, %vm1098_vm5  ;;  %vm1364_vm11 = vcmask 1040384   ;;  %vm1424_vm5 = vcmask 392192  }
 0x3ec   : > { %v1094_v63 = vsub.f32 1.0, %v1093_v60  ;;  %v1091_v5 = vmul.f32 %v2393_v9, %v1090_v61  ;;  %vm1472_vm6 = vcmask 523264  }
 0x3ed   : > { %1819 = vmatmul.msk.bf16.vlgmr.msra.gmra.mxu2 %vm1057_vm0, %v1234_v62 }
 0x3ee   : > { %v1095_v1 = vmul.f32 %v1995_v55, %v1094_v63  ;;  %v1113_v10 = vsel %vm1107_vm9, 0.0, %v1091_v5 }
 0x3ef   : > { %v1115_v15 = vpack.c.bf16 %v1113_v10, %v1113_v10 }
 0x3f0   : > { %v1096_v6 = vadd.f32 %v1995_v55, %v1095_v1 }
 0x3f1   : > { %v1121_v9 = vunpack.c.l.b16 %v1115_v15 }
 0x3f2   : > { %v1100_v8 = vsel %vm1099_vm7, %v1995_v55, %v1096_v6  ;;  %vm1528_vm7 = vcmask 785408  }
 0x3f3   : > { %v1105_v13 = vsel %vm1102_vm8, %v1104_v7, %v1100_v8  ;;  %v1971_v8 = vld [vmem:[%s2589_s18] ss:$0 sm:$0xff] }
 0x3f4   : > { %v1106_v14 = vmul.f32 %v2397_v11, %v1105_v13  ;;  %v1878_v11 = vld [vmem:[%s2266_s23] sm:$0xff] }
 0x3f5   : > { %1299 = vmatpush.bf16.msrb.mxu3 %v1878_v11 }
 0x3f6   : > { %v1114_v16 = vsel %vm1108_vm14, 0.0, %v1106_v14 }
 0x3f7   : > { %v1116_v17 = vpack.c.bf16 %v1114_v16, %v1114_v16 }
 0x3f9   : > { %v1122_v18 = vunpack.c.l.b16 %v1116_v17 }
 0x3fb   : > { %v1123_v19 = vpack.c.b16 %v1122_v18, %v1121_v9 }
 0x3fd   : > { %1817 = vmatmul.msk.bf16.vlgmr.msrb.gmra.mxu0 %vm1057_vm0, %v1123_v19  ;;  %vm1288_vm0 = vcmask 261120  }
 0x470   : > { %v1252_v21 = vpop.f32.mrf.mxu2 }
 0x478   : > { %v1254_v22 = vpop.f32.mrf.mxu2 }
 0x479   : > { %v1939_v34 = vpack.i.bf16 %v1254_v22, %v1252_v21 }
 0x47a   : > { %v1145_v23 = vpop.f32.mrf.mxu0 }
 0x47b   : > { %1940 = vrot.lane.b32.xlu0 %v1939_v34, %s2071_s14 }
 0x482   : > { %v1147_v27 = vpop.f32.mrf.mxu0 }
 0x4ed   : > { %v1941_v35 = vpop.permute.xlu0 %1940 }
 0x4ee   : > { %v1943_v25 = vunpack.i.h.bf16 %v1941_v35  ;;  %v1942_v26 = vunpack.i.l.bf16 %v1941_v35  ;;  %v1881_v35 = vld [vmem:[%s2285_s22 + $0x8] sm:$0xff] }
 0x4f0   : > { %v1266_v24 = vsel %vm871_vm2, %v1147_v27, %v1943_v25  ;;  %v1265_v28 = vsel %vm871_vm2, %v1145_v23, %v1942_v26  ;;  %v1882_v23 = vld [vmem:[%s2285_s22 + $0x10] sm:$0xff]  ;;  %v1880_v25 = vld [vmem:[%s2285_s22] sm:$0xff] }
 0x4f1   : > { %v1271_v29 = vpack.c.bf16 %v1266_v24, %v1265_v28  ;;  %1433 = vmatpush.bf16.msra.mxu0 %v1882_v23 }
 0x4f3   : > { %1828 = vmatmul.msk.bf16.vlgmr.msrb.gmra.mxu3 %vm1288_vm0, %v1271_v29 }
 0x4f5   : > { %1434 = vmatpush.bf16.msra.mxu0 %v1881_v35 }
 0x4f9   : > { %1435 = vmatpush.bf16.msra.mxu0 %v1880_v25 }
 0x576   : > { %v1301_v31 = vpop.f32.mrf.mxu3 }
 0x577   : > { %v1302_v32 = vadd.f32 %v1969_v30, %v1301_v31 }
 0x579   : > { %v2430_v33 = vadd.f32 %v1302_v32, %v2305_v2 }
 0x57b   : > { %v1308_v36 = vsel %vm871_vm2, %v2430_v33, 0.0 }
 0x57c   : > { %1309 = vadd.xlane.f32.xlu1 %v1308_v36 }
 0x57e   : > { %v1303_v37 = vpop.f32.mrf.mxu3 }
 0x57f   : > { %v1304_v38 = vadd.f32 %v1969_v30, %v1303_v37 }
 0x581   : > { %v2435_v39 = vadd.f32 %v1304_v38, %v2310_v4 }
 0x583   : > { %v1311_v40 = vsel %vm875_vm3, %v2435_v39, 0.0 }
 0x584   : > { %1312 = vadd.xlane.f32.xlu2 %v1311_v40 }
 0x5ef   : > { %v1310_v41 = vpop.xlane.xlu1 %1309 }
 0x5f0   : > { %v1314_v42 = vmul.f32 %v1310_v41, %v2314_v12  ;;  %v1888_v41 = vld [vmem:[%s2294_s19 + $0x28] sm:$0xff] }
 0x5f1   : > { %1534 = vmatpush.bf16.msrb.mxu1 %v1888_v41 }
 0x5f2   : > { %v1316_v43 = vsub.f32 %v2430_v33, %v1314_v42  ;;  %v1887_v42 = vld [vmem:[%s2294_s19 + $0x20] sm:$0xff] }
 0x5f4   : > { %v1318_v2 = vmul.f32 %v1316_v43, %v1316_v43 }
 0x5f5   : > { %1535 = vmatpush.bf16.msrb.mxu1 %v1887_v42 }
 0x5f6   : > { %v1320_v44 = vsel %vm871_vm2, %v1318_v2, 0.0 }
 0x5f7   : > { %v1313_v45 = vpop.xlane.xlu2 %1312  ;;  %1321 = vadd.xlane.f32.xlu2 %v1320_v44  ;;  %v1972_v44 = vld [vmem:[%s822_s10] ss:$0 sm:$0xff]  ;;  %s2073_s10 = smov 64  }
 0x5f8   : > { %v1315_v46 = vmul.f32 %v1313_v45, %v2314_v12 }
 0x5fa   : > { %v1317_v47 = vsub.f32 %v2435_v39, %v1315_v46 }
 0x5fc   : > { %v1319_v4 = vmul.f32 %v1317_v47, %v1317_v47 }
 0x5fe   : > { %v1323_v48 = vsel %vm875_vm3, %v1319_v4, 0.0 }
 0x5ff   : > { %1324 = vadd.xlane.f32.xlu2 %v1323_v48 }
 0x66a   : > { %v1322_v49 = vpop.xlane.xlu2 %1321 }
 0x66b   : > { %v1326_v50 = vmul.f32 %v1322_v49, %v2314_v12 }
 0x66d   : > { %v1328_v51 = vadd.f32 1e-05, %v1326_v50 }
 0x66f   : > { %1996 = vrsqrt.f32 %v1328_v51  ;;  %vm1336_vm10 = vweird.f32 %v1328_v51 }
 0x672   : > { %v1325_v52 = vpop.xlane.xlu2 %1324 }
 0x673   : > { %v1327_v53 = vmul.f32 %v1325_v52, %v2314_v12  ;;  %v1970_v12 = vld [vmem:[%s2587_s2] ss:$0 sm:$0xff] }
 0x675   : > { %v1997_v54 = vpop.eup %1996  ;;  %v1329_v55 = vadd.f32 1e-05, %v1327_v53 }
 0x676   : > { %v1331_v56 = vmul.f32 %v1997_v54, %v1328_v51  ;;  %vm1337_vm9 = vweird.f32 %v1997_v54 }
 0x677   : > { %1998 = vrsqrt.f32 %v1329_v55  ;;  %vm1338_vm12 = vmor %vm1336_vm10, %vm1337_vm9  ;;  %vm1346_vm14 = vweird.f32 %v1329_v55 }
 0x678   : > { %v1332_v57 = vmul.f32 %v1997_v54, %v1331_v56 }
 0x67a   : > { %v1333_v58 = vmul.f32 0.5, %v1332_v57 }
 0x67c   : > { %v1334_v59 = vsub.f32 1.5, %v1333_v58  ;;  %v1885_v58 = vld [vmem:[%s2294_s19 + $0x10] sm:$0xff] }
 0x67d   : > { %v1999_v60 = vpop.eup %1998 }
 0x67e   : > { %v1335_v61 = vmul.f32 %v1997_v54, %v1334_v59  ;;  %v1341_v62 = vmul.f32 %v1999_v60, %v1329_v55  ;;  %vm1347_vm13 = vweird.f32 %v1999_v60  ;;  %v1884_v59 = vld [vmem:[%s2294_s19 + $0x8] sm:$0xff] }
 0x67f   : > { %vm1348_vm15 = vmor %vm1346_vm14, %vm1347_vm13 }
 0x680   : > { %v1339_v63 = vsel %vm1338_vm12, %v1997_v54, %v1335_v61  ;;  %v1342_v0 = vmul.f32 %v1999_v60, %v1341_v62 }
 0x681   : > { %v1350_v1 = vmul.f32 %v1339_v63, %v1316_v43  ;;  %v1886_v43 = vld [vmem:[%s2294_s19 + $0x18] sm:$0xff] }
 0x682   : > { %v1343_v3 = vmul.f32 0.5, %v1342_v0  ;;  %1536 = vmatpush.bf16.msrb.mxu1 %v1886_v43 }
 0x683   : > { %v1355_v7 = vmul.f32 %v1970_v12, %v1350_v1 }
 0x684   : > { %v1344_v5 = vsub.f32 1.5, %v1343_v3 }
 0x685   : > { %v1360_v14 = vadd.f32 %v1971_v8, %v1355_v7 }
 0x686   : > { %v1345_v6 = vmul.f32 %v1999_v60, %v1344_v5  ;;  %1537 = vmatpush.bf16.msrb.mxu1 %v1885_v58 }
 0x687   : > { %v1372_v17 = vrot.slane %v1360_v14, 1  ;;  %v1365_v19 = vrot.slane %v1360_v14, 7 }
 0x688   : > { %v1349_v10 = vsel %vm1348_vm15, %v1999_v60, %v1345_v6  ;;  %v1883_v60 = vld [vmem:[%s2294_s19] sm:$0xff] }
 0x689   : > { %v1351_v13 = vmul.f32 %v1349_v10, %v1317_v47  ;;  %v1370_v31 = vsel %vm1364_vm11, 0.0, %v1365_v19 }
 0x68a   : > { %1538 = vmatpush.bf16.msrb.mxu1 %v1884_v59 }
 0x68b   : > { %v1356_v15 = vmul.f32 %v1970_v12, %v1351_v13  ;;  %v1973_v13 = vld [vmem:[%s830_s1] ss:$0 sm:$0xff] }
 0x68d   : > { %v1361_v16 = vadd.f32 %v1971_v8, %v1356_v15 }
 0x68e   : > { %1539 = vmatpush.bf16.msrb.mxu1 %v1883_v60 }
 0x68f   : > { %v1944_v9 = vpack.i.bf16 %v1361_v16, %v1360_v14  ;;  %v1373_v18 = vrot.slane %v1361_v16, 1  ;;  %v1366_v20 = vrot.slane %v1361_v16, 7 }
 0x691   : > { %1945 = vrot.lane.b32.xlu0 %v1944_v9, %s2071_s14  ;;  %v1374_v21 = vsel %vm1371_vm1, %v1372_v17, %v1373_v18  ;;  %v1377_v22 = vsel %vm1376_vm4, %v1373_v18, 0.0  ;;  %v1367_v34 = vsel %vm1364_vm11, %v1365_v19, %v1366_v20 }
 0x692   : > { %v1949_v11 = vpack.i.bf16 %v1377_v22, %v1374_v21 }
 0x694   : > { %1950 = vrot.lane.b32.xlu2 %v1949_v11, %s2072_s20 }
 0x6ee   : > { %v1951_v26 = vpop.permute.xlu2 %1950 }
 0x6ef   : > { %v1953_v29 = vunpack.i.h.bf16 %v1951_v26  ;;  %v1952_v30 = vunpack.i.l.bf16 %v1951_v26 }
 0x703   : > { %v1946_v27 = vpop.permute.xlu0 %1945 }
 0x704   : > { %v1948_v24 = vunpack.i.h.bf16 %v1946_v27  ;;  %v1947_v28 = vunpack.i.l.bf16 %v1946_v27 }
 0x706   : > { %v1391_v32 = vsel %vm871_vm2, %v1370_v31, %v1947_v28  ;;  %v1392_v36 = vsel %vm871_vm2, %v1367_v34, %v1948_v24 }
 0x707   : > { %v1393_v37 = vsel %vm1288_vm0, %v1391_v32, %v1952_v30  ;;  %v1394_v38 = vsel %vm1288_vm0, %v1392_v36, %v1953_v29 }
 0x708   : > { %v1401_v40 = vpack.c.bf16 %v1394_v38, %v1393_v37 }
 0x70a   : > { %1841 = vmatmul.msk.bf16.vlgmr.msra.gmra.mxu0 %vm1424_vm5, %v1401_v40 }
 0x787   : > { %v1437_v2 = vpop.f32.mrf.mxu0 }
 0x788   : > { %v1438_v45 = vadd.f32 %v1972_v44, %v1437_v2 }
 0x78a   : > { %v1442_v47 = vmax.f32 %v1438_v45, 0.0 }
 0x78c   : > { %v1446_v49 = vrot.slane %v1442_v47, 7  ;;  %v1452_v54 = vrot.slane %v1442_v47, 1 }
 0x78e   : > { %v1451_v1 = vsel %vm1364_vm11, 0.0, %v1446_v49 }
 0x78f   : > { %v1439_v46 = vpop.f32.mrf.mxu0 }
 0x790   : > { %v1440_v4 = vadd.f32 %v1972_v44, %v1439_v46 }
 0x792   : > { %v1443_v48 = vmax.f32 %v1440_v4, 0.0 }
 0x794   : > { %v1447_v50 = vrot.slane %v1443_v48, 7  ;;  %v1954_v51 = vpack.i.bf16 %v1443_v48, %v1442_v47  ;;  %v1453_v52 = vrot.slane %v1443_v48, 1 }
 0x796   : > { %1955 = vrot.lane.b32.xlu0 %v1954_v51, %s2072_s20  ;;  %v1448_v53 = vsel %vm1364_vm11, %v1446_v49, %v1447_v50  ;;  %v1454_v55 = vsel %vm1371_vm1, %v1452_v54, %v1453_v52  ;;  %v1456_v56 = vsel %vm1376_vm4, %v1453_v52, 0.0 }
 0x797   : > { %v1959_v57 = vpack.i.bf16 %v1456_v56, %v1454_v55 }
 0x79e   : > { %1960 = vrot.lane.b32.xlu0 %v1959_v57, %s2073_s10 }
 0x808   : > { %v1956_v61 = vpop.permute.xlu0 %1955 }
 0x809   : > { %v1958_v62 = vunpack.i.h.bf16 %v1956_v61  ;;  %v1957_v63 = vunpack.i.l.bf16 %v1956_v61 }
 0x80b   : > { %v1470_v5 = vsel %vm1288_vm0, %v1451_v1, %v1957_v63  ;;  %v1471_v6 = vsel %vm1288_vm0, %v1448_v53, %v1958_v62 }
 0x810   : > { %v1961_v0 = vpop.permute.xlu0 %1960 }
 0x811   : > { %v1963_v3 = vunpack.i.h.bf16 %v1961_v0  ;;  %v1962_v12 = vunpack.i.l.bf16 %v1961_v0 }
 0x813   : > { %v1473_v7 = vsel %vm1472_vm6, %v1470_v5, %v1962_v12  ;;  %v1474_v8 = vsel %vm1472_vm6, %v1471_v6, %v1963_v3 }
 0x814   : > { %v1487_v10 = vpack.c.bf16 %v1474_v8, %v1473_v7 }
 0x816   : > { %1866 = vmatmul.msk.bf16.vlgmr.msrb.gmra.mxu1 %vm1528_vm7, %v1487_v10 }
 0x893   : > { %v1541_v14 = vpop.f32.mrf.mxu1 }
 0x894   : > { %v1542_v15 = vadd.f32 %v1973_v13, %v1541_v14 }
 0x896   : > { %v1546_v16 = vadd.f32 %v1542_v15, %v2430_v33 }
 0x898   : > { %1548 = vst.msk [vmem:[%s2299_s30] sm:$0xff] %vm871_vm2, %v1546_v16 }
 0x89b   : > { %v1543_v17 = vpop.f32.mrf.mxu1 }
 0x89c   : > { %v1544_v9 = vadd.f32 %v1973_v13, %v1543_v17 }
 0x89e   : > { %v1547_v18 = vadd.f32 %v1544_v9, %v2435_v39 }
 0x8a0   : > { %1549 = vst.msk [vmem:[%s2299_s30 + $0x8] sm:$0xf] %vm875_vm3, %v1547_v18 }
 0x8a1 PF: > { %s2591_s4 = sld [smem:[#allocation10_spill]] }
 0x8a2   : > { %s2592_s24 = sld [smem:[#allocation8_spill]] }
 0x8a3   : > { %s2593_s25 = sld [smem:[#allocation9_spill]] }
 0x8a4   : > { %s2595_s26 = sld [smem:[#allocation12_spill]] }
 0x8a7   : > { %s42_s27 = sadd.s32 1, %s2591_s4   ;;  %s2594_s4 = sld [smem:[#allocation11_spill]] }
 0x8a8   : > { %p39_p8 = scmp.ge.s32.totalorder %s42_s27, 6  }
 0x8aa   :  { %41 = sbr.rel (!%p39_p8) target bundleno = 28 (0x1c), region = 170 }

</bundles_post_ra>
